<compile_context>
chip_gen: v5e
topology: v5e:2x2
jax: 0.10.0
libtpu: 0.0.40
codegen_flags: <defaults>
</compile_context>

<pallas_src>
import jax
import jax.numpy as jnp
from jax import lax
from jax.experimental import pallas as pl
from jax.experimental.pallas import tpu as pltpu

EPS = 1e-5
LANE = 128


# ------------------------------ small helpers ------------------------------ #
def _round_up(x, m):
    return ((x + m - 1) // m) * m


def _pick_tile(total, target):
    """Largest divisor of `total` <= target, preferring multiples of 16 (bf16 pack)."""
    for align in (16, 8):
        best = 0
        t = align
        while t <= min(total, target):
            if total % t == 0:
                best = t
            t += align
        if best:
            return best
    return total


def _pick_row_tile(ho, wo, target_rows):
    """Largest divisor of Ho whose row tile (tr * Wo) stays <= target_rows."""
    best = 1
    for tr in range(1, ho + 1):
        if ho % tr == 0 and tr * wo <= target_rows:
            best = tr
    return best


def _cparams(*dimension_semantics):
    return pltpu.CompilerParams(dimension_semantics=tuple(dimension_semantics))


def _bn_scale_shift(sum_p, sq_p, gamma, beta, count):
    # Reduce per-tile partial stats -> training-mode (biased) BN scale/shift.
    cpad = gamma.shape[0]
    s1 = jnp.sum(sum_p.reshape(-1, cpad), axis=0)
    s2 = jnp.sum(sq_p.reshape(-1, cpad), axis=0)
    mean = s1 / count
    var = jnp.maximum(s2 / count - mean * mean, 0.0)
    scale = gamma * lax.rsqrt(var + EPS)
    shift = beta - mean * scale
    return scale.reshape(1, cpad), shift.reshape(1, cpad)


# --------------------------------- kernels --------------------------------- #
def _make_conv3x3_kernel(tr, wo, cinp, cpad, pre_act):
    """3x3 stride-1 conv of one (tr, wo) output row tile.

    Builds the zero-padded halo slab in a bf16 VMEM scratch (no padded HBM
    copy).  If `pre_act`, the previous layer's BN scale/shift + ReLU is fused
    into the slab loads.  When channels are lane aligned the dx taps are folded
    along K (3 MXU matmuls, K=3*C); otherwise nine K=C matmuls are issued.
    Emits per-tile f32 BN partial statistics of the raw conv output.
    """
    fold = (cinp % LANE) == 0

    def kernel(*args):
        if pre_act:
            x_ref, w_ref, a_ref, b_ref, y_ref, s_ref, q_ref, p_scr = args
        else:
            x_ref, w_ref, y_ref, s_ref, q_ref, p_scr = args

        r = pl.program_id(1)
        nr = pl.num_programs(1)
        r0 = r * tr

        def act(rows):
            v = rows.astype(jnp.float32)
            if pre_act:
                v = jnp.maximum(v * a_ref[...].reshape(1, 1, cinp)
                                + b_ref[...].reshape(1, 1, cinp), 0.0)
            return v.astype(jnp.bfloat16)

        # zero-padded activation slab; borders stay zero ("same" conv padding)
        p_scr[...] = jnp.zeros_like(p_scr)
        p_scr[1:tr + 1, 1:wo + 1, :] = act(x_ref[0, pl.ds(r0, tr), :, :])

        @pl.when(r > 0)
        def _():
            p_scr[0:1, 1:wo + 1, :] = act(x_ref[0, pl.ds(r0 - 1, 1), :, :])

        @pl.when(r < nr - 1)
        def _():
            p_scr[tr + 1:tr + 2, 1:wo + 1, :] = act(x_ref[0, pl.ds(r0 + tr, 1), :, :])

        acc = jnp.zeros((tr * wo, cpad), jnp.float32)
        if fold:
            # dx taps folded along K: 3 matmuls with K = 3*cinp (better MXU fill)
            for dy in range(3):
                blk = p_scr[dy:dy + tr, :, :]                    # (tr, wo+2, cinp)
                f = jnp.concatenate(
                    [blk[:, 0:wo, :], blk[:, 1:wo + 1, :], blk[:, 2:wo + 2, :]],
                    axis=-1)                                     # (tr, wo, 3*cinp)
                acc = acc + jnp.dot(f.reshape(tr * wo, 3 * cinp), w_ref[dy],
                                    preferred_element_type=jnp.float32)
        else:
            # small / unaligned channel count: nine K = cinp matmuls
            for dy in range(3):
                w_dy = w_ref[dy]                                 # (3*cinp, cpad)
                for dx in range(3):
                    slab = p_scr[dy:dy + tr, dx:dx + wo, :].reshape(tr * wo, cinp)
                    acc = acc + jnp.dot(slab, w_dy[dx * cinp:(dx + 1) * cinp, :],
                                        preferred_element_type=jnp.float32)

        y_ref[...] = acc.reshape(1, tr, wo, cpad).astype(y_ref.dtype)
        s_ref[...] = jnp.sum(acc, axis=0).reshape(s_ref.shape)
        q_ref[...] = jnp.sum(acc * acc, axis=0).reshape(q_ref.shape)

    return kernel


def _conv3x3(x, wfold, scale, shift, cpad, *, max_rows):
    """Raw 3x3 stride-1 conv: (N, H, W, Cin) -> (N, H, W, cpad) bf16 + BN stats."""
    N, H, W, Cin = x.shape
    pre_act = scale is not None
    TR = _pick_row_tile(H, W, max_rows)
    nrb = H // TR

    in_specs = [pl.BlockSpec((1, H, W, Cin), lambda n, r: (n, 0, 0, 0)),
                pl.BlockSpec((3, 3 * Cin, cpad), lambda n, r: (0, 0, 0))]
    operands = [x, wfold]
    if pre_act:
        in_specs += [pl.BlockSpec((1, Cin), lambda n, r: (0, 0)),
                     pl.BlockSpec((1, Cin), lambda n, r: (0, 0))]
        operands += [scale, shift]

    return pl.pallas_call(
        _make_conv3x3_kernel(TR, W, Cin, cpad, pre_act),
        grid=(N, nrb),
        in_specs=in_specs,
        out_specs=[
            pl.BlockSpec((1, TR, W, cpad), lambda n, r: (n, r, 0, 0)),
            pl.BlockSpec((1, 1, 1, cpad), lambda n, r: (n, r, 0, 0)),
            pl.BlockSpec((1, 1, 1, cpad), lambda n, r: (n, r, 0, 0)),
        ],
        out_shape=(
            jax.ShapeDtypeStruct((N, H, W, cpad), jnp.bfloat16),
            jax.ShapeDtypeStruct((N, nrb, 1, cpad), jnp.float32),
            jax.ShapeDtypeStruct((N, nrb, 1, cpad), jnp.float32),
        ),
        scratch_shapes=[pltpu.VMEM((TR + 2, W + 2, Cin), jnp.bfloat16)],
        compiler_params=_cparams("parallel", "parallel"),
    )(*operands)


def _conv1_proj_kernel(p_ref, w_ref, y_ref, sr_ref, ys_ref, yq_ref, ss_ref, sq_ref):
    # conv1 and the 1x1 projection shortcut as one wide matmul (N = 2*Cpad cols),
    # each with f32 partial BN statistics.
    cpad = y_ref.shape[-1]
    acc = jnp.dot(p_ref[...], w_ref[...], preferred_element_type=jnp.float32)
    y = acc[:, :cpad]
    s = acc[:, cpad:]
    y_ref[...] = y.astype(y_ref.dtype)
    sr_ref[...] = s.astype(sr_ref.dtype)
    ys_ref[...] = jnp.sum(y, axis=0).reshape(ys_ref.shape)
    yq_ref[...] = jnp.sum(y * y, axis=0).reshape(yq_ref.shape)
    ss_ref[...] = jnp.sum(s, axis=0).reshape(ss_ref.shape)
    sq_ref[...] = jnp.sum(s * s, axis=0).reshape(sq_ref.shape)


def _make_finalize_id_kernel(cout):
    # out = relu(bn2(y2) + x), writing only the Cout valid lanes (f32).
    def kernel(y2_ref, xsc_ref, a2_ref, b2_ref, o_ref):
        z = y2_ref[...].astype(jnp.float32) * a2_ref[...] + b2_ref[...]
        z = z[:, :cout] + xsc_ref[...].astype(jnp.float32)
        o_ref[...] = jnp.maximum(z, 0.0).astype(o_ref.dtype)
    return kernel


def _make_finalize_proj_kernel(cout):
    # out = relu(bn2(y2) + bn_sc(shortcut_conv)), writing only Cout lanes (f32).
    def kernel(y2_ref, sr_ref, a2_ref, b2_ref, asc_ref, bsc_ref, o_ref):
        z = y2_ref[...].astype(jnp.float32) * a2_ref[...] + b2_ref[...]
        s = sr_ref[...].astype(jnp.float32) * asc_ref[...] + bsc_ref[...]
        o_ref[...] = jnp.maximum(z + s, 0.0)[:, :cout].astype(o_ref.dtype)
    return kernel


# --------------------------------- wrapper ---------------------------------- #
def residual_block_pallas(x_nchw, params, stride, *, max_rows=512):
    x = jnp.transpose(x_nchw, (0, 2, 3, 1)).astype(jnp.float32)      # NCHW -> NHWC
    N, H, W, Cin = x.shape
    Cout = params["w1"].shape[-1]
    Cpad = _round_up(Cout, LANE)              # lane-dense intermediate channels
    proj = "wsc" in params

    g1 = jnp.pad(params["g1"].astype(jnp.float32), (0, Cpad - Cout))
    b1 = jnp.pad(params["b1"].astype(jnp.float32), (0, Cpad - Cout))
    g2 = jnp.pad(params["g2"].astype(jnp.float32), (0, Cpad - Cout))
    b2 = jnp.pad(params["b2"].astype(jnp.float32), (0, Cpad - Cout))

    # ---- stage 1: conv1 (+ fused 1x1 projection shortcut) ------------------ #
    if proj:
        # strided conv1: im2col matmul with the projection folded into extra
        # output columns (wsc lives in the center-tap rows of the weight).
        Ho = (H + 2 - 3) // stride + 1
        Wo = (W + 2 - 3) // stride + 1
        M = N * Ho * Wo
        xb = x.astype(jnp.bfloat16)
        xp = jnp.pad(xb, ((0, 0), (1, 1), (1, 1), (0, 0)))
        cols = [xp[:, dy:dy + stride * Ho:stride, dx:dx + stride * Wo:stride, :]
                for dy in range(3) for dx in range(3)]
        p1 = jnp.stack(cols, axis=3).reshape(M, 9 * Cin)             # (M, 9*Cin) bf16

        w1 = jnp.pad(params["w1"], ((0, 0), (0, 0), (0, 0), (0, Cpad - Cout)))
        w1 = w1.reshape(9 * Cin, Cpad)
        wsc = jnp.pad(params["wsc"].reshape(Cin, Cout), ((0, 0), (0, Cpad - Cout)))
        wsc_cols = jnp.zeros((9 * Cin, Cpad), jnp.float32).at[4 * Cin:5 * Cin].set(wsc)
        wc = jnp.concatenate([w1, wsc_cols], axis=1).astype(jnp.bfloat16)

        TM1 = _pick_tile(M, max_rows)
        n_t1 = M // TM1
        row_spec = pl.BlockSpec((TM1, Cpad), lambda i: (i, 0))
        stat_spec = pl.BlockSpec((1, 1, Cpad), lambda i: (i, 0, 0))
        stat_shape = jax.ShapeDtypeStruct((n_t1, 1, Cpad), jnp.float32)
        y1, sraw, ys, yq, ss, sq = pl.pallas_call(
            _conv1_proj_kernel,
            grid=(n_t1,),
            in_specs=[pl.BlockSpec((TM1, 9 * Cin), lambda i: (i, 0)),
                      pl.BlockSpec((9 * Cin, 2 * Cpad), lambda i: (0, 0))],
            out_specs=[row_spec, row_spec, stat_spec, stat_spec, stat_spec, stat_spec],
            out_shape=(jax.ShapeDtypeStruct((M, Cpad), jnp.bfloat16),
                       jax.ShapeDtypeStruct((M, Cpad), jnp.bfloat16),
                       stat_shape, stat_shape, stat_shape, stat_shape),
            compiler_params=_cparams("parallel"),
        )(p1, wc)
        y1 = y1.reshape(N, Ho, Wo, Cpad)

        gsc = jnp.pad(params["gsc"].astype(jnp.float32), (0, Cpad - Cout))
        bsc = jnp.pad(params["bsc"].astype(jnp.float32), (0, Cpad - Cout))
        scale_sc, shift_sc = _bn_scale_shift(ss, sq, gsc, bsc, float(M))
    else:
        # stride-1 conv1: direct shifted-tap kernel, no im2col / padded copy in
        # HBM; the f32 input is cast to bf16 inside the kernel prologue.
        Ho, Wo = H, W
        M = N * Ho * Wo
        w1f = jnp.pad(params["w1"], ((0, 0), (0, 0), (0, 0), (0, Cpad - Cout)))
        w1f = w1f.reshape(3, 3 * Cin, Cpad).astype(jnp.bfloat16)
        y1, ys, yq = _conv3x3(x, w1f, None, None, Cpad, max_rows=max_rows)

    scale1, shift1 = _bn_scale_shift(ys, yq, g1, b1, float(M))

    # ---- stage 2: conv2 with bn1+relu and the zero halo fused in-kernel ---- #
    w2f = jnp.pad(params["w2"], ((0, 0), (0, 0), (0, Cpad - Cout), (0, Cpad - Cout)))
    w2f = w2f.reshape(3, 3 * Cpad, Cpad).astype(jnp.bfloat16)
    y2, zs, zq = _conv3x3(y1, w2f, scale1, shift1, Cpad, max_rows=max_rows)
    scale2, shift2 = _bn_scale_shift(zs, zq, g2, b2, float(M))

    # ---- stage 3: bn2 + shortcut add + relu (f32, Cout lanes only) ---------- #
    TM = _pick_tile(M, max_rows)
    n_t = M // TM
    row_spec = pl.BlockSpec((TM, Cpad), lambda i: (i, 0))
    vec_spec = pl.BlockSpec((1, Cpad), lambda i: (0, 0))
    out_spec = pl.BlockSpec((TM, Cout), lambda i: (i, 0))
    out_shape = jax.ShapeDtypeStruct((M, Cout), jnp.float32)
    y2f = y2.reshape(M, Cpad)
    if proj:
        out = pl.pallas_call(
            _make_finalize_proj_kernel(Cout),
            grid=(n_t,),
            in_specs=[row_spec, row_spec, vec_spec, vec_spec, vec_spec, vec_spec],
            out_specs=out_spec,
            out_shape=out_shape,
            compiler_params=_cparams("parallel"),
        )(y2f, sraw, scale2, shift2, scale_sc, shift_sc)
    else:
        xsc = x.reshape(M, Cin)                  # identity shortcut, no HBM copy
        out = pl.pallas_call(
            _make_finalize_id_kernel(Cout),
            grid=(n_t,),
            in_specs=[row_spec, pl.BlockSpec((TM, Cin), lambda i: (i, 0)),
                      vec_spec, vec_spec],
            out_specs=out_spec,
            out_shape=out_shape,
            compiler_params=_cparams("parallel"),
        )(y2f, xsc, scale2, shift2)

    # Module contract is NCHW: only this layout transform is left to XLA.
    return jnp.transpose(out.reshape(N, Ho, Wo, Cout), (0, 3, 1, 2))


# ----------------------------- params / reference --------------------------- #
def init_params(key, in_channels, out_channels, stride):
    ks = jax.random.split(key, 9)
    p = {
        "w1": 0.1 * jax.random.normal(ks[0], (3, 3, in_channels, out_channels), jnp.float32),
        "g1": 1.0 + 0.1 * jax.random.normal(ks[1], (out_channels,), jnp.float32),
        "b1": 0.1 * jax.random.normal(ks[2], (out_channels,), jnp.float32),
        "w2": 0.1 * jax.random.normal(ks[3], (3, 3, out_channels, out_channels), jnp.float32),
        "g2": 1.0 + 0.1 * jax.random.normal(ks[4], (out_channels,), jnp.float32),
        "b2": 0.1 * jax.random.normal(ks[5], (out_channels,), jnp.float32),
    }
    if stride != 1 or in_channels != out_channels:
        p["wsc"] = 0.1 * jax.random.normal(ks[6], (1, 1, in_channels, out_channels), jnp.float32)
        p["gsc"] = 1.0 + 0.1 * jax.random.normal(ks[7], (out_channels,), jnp.float32)
        p["bsc"] = 0.1 * jax.random.normal(ks[8], (out_channels,), jnp.float32)
    return p


def residual_block_ref(x_nchw, params, stride):
    # Pure-JAX reference (training-mode BN).  Inputs/weights are rounded through
    # bf16 to mirror the kernel's MXU input precision; arithmetic stays f32.
    bf = lambda a: a.astype(jnp.bfloat16).astype(jnp.float32)
    x = bf(jnp.transpose(x_nchw, (0, 2, 3, 1)).astype(jnp.float32))

    def conv(v, w, s, pad):
        return lax.conv_general_dilated(
            v, bf(w), (s, s), ((pad, pad), (pad, pad)),
            dimension_numbers=("NHWC", "HWIO", "NHWC"))

    def bn(v, g, b):
        mu = jnp.mean(v, axis=(0, 1, 2), keepdims=True)
        var = jnp.mean((v - mu) ** 2, axis=(0, 1, 2), keepdims=True)
        return (v - mu) * lax.rsqrt(var + EPS) * g + b

    h = jax.nn.relu(bn(conv(x, params["w1"], stride, 1), params["g1"], params["b1"]))
    out = bn(conv(h, params["w2"], 1, 1), params["g2"], params["b2"])
    if "wsc" in params:
        sc = bn(conv(x, params["wsc"], stride, 0), params["gsc"], params["bsc"])
    else:
        sc = x
    return jnp.transpose(jax.nn.relu(out + sc), (0, 3, 1, 2))


# TODO(synk): BatchNorm running_mean/running_var buffer updates are training-only
# bookkeeping with no effect on the forward output; not materialized here.

def _max_scaled_err(a, b):
    return float(jnp.max(jnp.abs(a - b) / (jnp.abs(b) + 1.0)))


if __name__ == "__main__":
    key = jax.random.PRNGKey(0)
    kx1, kp1, kx2, kp2 = jax.random.split(key, 4)

    # Small max_rows keeps multiple M / row tiles at toy shapes so cross-tile
    # BN statistics and conv halo handling are exercised (use ~512 for real shapes).

    # --- projection-shortcut block: Cin=4 -> Cout=8, stride=2 --------------- #
    N, Cin, H, W = 2, 4, 16, 16
    Cout, stride = 8, 2
    x = jax.random.normal(kx1, (N, Cin, H, W), jnp.float32)          # PyTorch NCHW
    params = init_params(kp1, Cin, Cout, stride)
    out = jax.jit(lambda v: residual_block_pallas(v, params, stride, max_rows=48))(x)
    out = jax.block_until_ready(out)
    ref = residual_block_ref(x, params, stride)
    assert out.shape == (N, Cout, H // stride, W // stride), out.shape
    err = _max_scaled_err(out, ref)
    assert err < 0.1, ("projection branch", err)

    # --- identity-shortcut block: Cin=Cout=8, stride=1 ----------------------- #
    Ci = 8
    x2 = jax.random.normal(kx2, (N, Ci, H, W), jnp.float32)
    params2 = init_params(kp2, Ci, Ci, 1)
    out2 = jax.jit(lambda v: residual_block_pallas(v, params2, 1, max_rows=64))(x2)
    out2 = jax.block_until_ready(out2)
    ref2 = residual_block_ref(x2, params2, 1)
    assert out2.shape == (N, Ci, H, W), out2.shape
    err2 = _max_scaled_err(out2, ref2)
    assert err2 < 0.1, ("identity branch", err2)

    print("KERNEL_OK")
</pallas_src>

<mosaic_0001>
module attributes {stable_mosaic.version = 11 : i64} {
  func.func @_conv1_proj_kernel(%arg0: i32, %arg1: memref<32x36xbf16, #tpu.memory_space<vmem>>, %arg2: memref<36x256xbf16, #tpu.memory_space<vmem>>, %arg3: memref<32x128xbf16, #tpu.memory_space<vmem>>, %arg4: memref<32x128xbf16, #tpu.memory_space<vmem>>, %arg5: memref<1x1x128xf32, #tpu.memory_space<vmem>>, %arg6: memref<1x1x128xf32, #tpu.memory_space<vmem>>, %arg7: memref<1x1x128xf32, #tpu.memory_space<vmem>>, %arg8: memref<1x1x128xf32, #tpu.memory_space<vmem>>) attributes {dimension_semantics = [#tpu.dimension_semantics<parallel>], iteration_bounds = array<i64: 4>, scalar_prefetch = 0 : i64, scratch_operands = 0 : i64, tpu.core_type = #tpu.core_type<tc>, window_params = [{transform_indices = @transform_0, window_bounds = array<i64: 32, 36>}, {pipeline_mode = #tpu.pipeline_mode<synchronous>, transform_indices = @transform_1, window_bounds = array<i64: 36, 256>}, {transform_indices = @transform_2, window_bounds = array<i64: 32, 128>}, {transform_indices = @transform_3, window_bounds = array<i64: 32, 128>}, {transform_indices = @transform_4, window_bounds = array<i64: 1, 1, 128>}, {transform_indices = @transform_5, window_bounds = array<i64: 1, 1, 128>}, {transform_indices = @transform_6, window_bounds = array<i64: 1, 1, 128>}, {transform_indices = @transform_7, window_bounds = array<i64: 1, 1, 128>}]} {
    %c0 = arith.constant 0 : index
    %c0_0 = arith.constant 0 : index
    %0 = vector.load %arg1[%c0, %c0_0] : memref<32x36xbf16, #tpu.memory_space<vmem>>, vector<32x36xbf16>
    %c0_1 = arith.constant 0 : index
    %c0_2 = arith.constant 0 : index
    %1 = vector.load %arg2[%c0_1, %c0_2] : memref<36x256xbf16, #tpu.memory_space<vmem>>, vector<36x256xbf16>
    %cst = arith.constant dense<0.000000e+00> : vector<32x256xf32>
    %2 = tpu.matmul %0, %1, %cst {dimension_numbers = #tpu.dot_dimension_numbers<[1], [0], [0], [1], [0, 0, 1, 1], [], []>} : vector<32x36xbf16>, vector<36x256xbf16>, vector<32x256xf32> -> vector<32x256xf32>
    %3 = vector.extract_strided_slice %2 {offsets = [0, 0], sizes = [32, 128], strides = [1, 1]} : vector<32x256xf32> to vector<32x128xf32>
    %4 = vector.extract_strided_slice %2 {offsets = [0, 128], sizes = [32, 128], strides = [1, 1]} : vector<32x256xf32> to vector<32x128xf32>
    %5 = arith.truncf %3 : vector<32x128xf32> to vector<32x128xbf16>
    %c0_3 = arith.constant 0 : index
    %c0_4 = arith.constant 0 : index
    %6 = vector.load %arg3[%c0_3, %c0_4] : memref<32x128xbf16, #tpu.memory_space<vmem>>, vector<32x128xbf16>
    tpu.vector_store %arg3[%c0_3, %c0_4], %5 {strides = array<i32>} : memref<32x128xbf16, #tpu.memory_space<vmem>>, vector<32x128xbf16>,
    %7 = arith.truncf %4 : vector<32x128xf32> to vector<32x128xbf16>
    %c0_5 = arith.constant 0 : index
    %c0_6 = arith.constant 0 : index
    %8 = vector.load %arg4[%c0_5, %c0_6] : memref<32x128xbf16, #tpu.memory_space<vmem>>, vector<32x128xbf16>
    tpu.vector_store %arg4[%c0_5, %c0_6], %7 {strides = array<i32>} : memref<32x128xbf16, #tpu.memory_space<vmem>>, vector<32x128xbf16>,
    %cst_7 = arith.constant dense<0.000000e+00> : vector<128xf32>
    %9 = vector.multi_reduction <add>, %3, %cst_7 [0] : vector<32x128xf32> to vector<128xf32>
    %10 = vector.shape_cast %9 : vector<128xf32> to vector<1x1x128xf32>
    %c0_8 = arith.constant 0 : index
    %c0_9 = arith.constant 0 : index
    %c0_10 = arith.constant 0 : index
    %11 = vector.load %arg5[%c0_8, %c0_9, %c0_10] : memref<1x1x128xf32, #tpu.memory_space<vmem>>, vector<1x1x128xf32>
    tpu.vector_store %arg5[%c0_8, %c0_9, %c0_10], %10 {strides = array<i32>} : memref<1x1x128xf32, #tpu.memory_space<vmem>>, vector<1x1x128xf32>,
    %12 = arith.mulf %3, %3 : vector<32x128xf32>
    %cst_11 = arith.constant dense<0.000000e+00> : vector<128xf32>
    %13 = vector.multi_reduction <add>, %12, %cst_11 [0] : vector<32x128xf32> to vector<128xf32>
    %14 = vector.shape_cast %13 : vector<128xf32> to vector<1x1x128xf32>
    %c0_12 = arith.constant 0 : index
    %c0_13 = arith.constant 0 : index
    %c0_14 = arith.constant 0 : index
    %15 = vector.load %arg6[%c0_12, %c0_13, %c0_14] : memref<1x1x128xf32, #tpu.memory_space<vmem>>, vector<1x1x128xf32>
    tpu.vector_store %arg6[%c0_12, %c0_13, %c0_14], %14 {strides = array<i32>} : memref<1x1x128xf32, #tpu.memory_space<vmem>>, vector<1x1x128xf32>,
    %cst_15 = arith.constant dense<0.000000e+00> : vector<128xf32>
    %16 = vector.multi_reduction <add>, %4, %cst_15 [0] : vector<32x128xf32> to vector<128xf32>
    %17 = vector.shape_cast %16 : vector<128xf32> to vector<1x1x128xf32>
    %c0_16 = arith.constant 0 : index
    %c0_17 = arith.constant 0 : index
    %c0_18 = arith.constant 0 : index
    %18 = vector.load %arg7[%c0_16, %c0_17, %c0_18] : memref<1x1x128xf32, #tpu.memory_space<vmem>>, vector<1x1x128xf32>
    tpu.vector_store %arg7[%c0_16, %c0_17, %c0_18], %17 {strides = array<i32>} : memref<1x1x128xf32, #tpu.memory_space<vmem>>, vector<1x1x128xf32>,
    %19 = arith.mulf %4, %4 : vector<32x128xf32>
    %cst_19 = arith.constant dense<0.000000e+00> : vector<128xf32>
    %20 = vector.multi_reduction <add>, %19, %cst_19 [0] : vector<32x128xf32> to vector<128xf32>
    %21 = vector.shape_cast %20 : vector<128xf32> to vector<1x1x128xf32>
    %c0_20 = arith.constant 0 : index
    %c0_21 = arith.constant 0 : index
    %c0_22 = arith.constant 0 : index
    %22 = vector.load %arg8[%c0_20, %c0_21, %c0_22] : memref<1x1x128xf32, #tpu.memory_space<vmem>>, vector<1x1x128xf32>
    tpu.vector_store %arg8[%c0_20, %c0_21, %c0_22], %21 {strides = array<i32>} : memref<1x1x128xf32, #tpu.memory_space<vmem>>, vector<1x1x128xf32>,
    return
  }
  func.func @transform_0(%arg0: i32) -> (i32, i32) {
    %c0_i32 = arith.constant 0 : i32
    %c0_i32_0 = arith.constant 0 : i32
    return %arg0, %c0_i32 : i32, i32
  }
  func.func @transform_1(%arg0: i32) -> (i32, i32) {
    %c0_i32 = arith.constant 0 : i32
    %c0_i32_0 = arith.constant 0 : i32
    %c0_i32_1 = arith.constant 0 : i32
    return %c0_i32, %c0_i32_0 : i32, i32
  }
  func.func @transform_2(%arg0: i32) -> (i32, i32) {
    %c0_i32 = arith.constant 0 : i32
    %c0_i32_0 = arith.constant 0 : i32
    return %arg0, %c0_i32 : i32, i32
  }
  func.func @transform_3(%arg0: i32) -> (i32, i32) {
    %c0_i32 = arith.constant 0 : i32
    %c0_i32_0 = arith.constant 0 : i32
    return %arg0, %c0_i32 : i32, i32
  }
  func.func @transform_4(%arg0: i32) -> (i32, i32, i32) {
    %c0_i32 = arith.constant 0 : i32
    %c0_i32_0 = arith.constant 0 : i32
    %c0_i32_1 = arith.constant 0 : i32
    return %arg0, %c0_i32, %c0_i32_0 : i32, i32, i32
  }
  func.func @transform_5(%arg0: i32) -> (i32, i32, i32) {
    %c0_i32 = arith.constant 0 : i32
    %c0_i32_0 = arith.constant 0 : i32
    %c0_i32_1 = arith.constant 0 : i32
    return %arg0, %c0_i32, %c0_i32_0 : i32, i32, i32
  }
  func.func @transform_6(%arg0: i32) -> (i32, i32, i32) {
    %c0_i32 = arith.constant 0 : i32
    %c0_i32_0 = arith.constant 0 : i32
    %c0_i32_1 = arith.constant 0 : i32
    return %arg0, %c0_i32, %c0_i32_0 : i32, i32, i32
  }
  func.func @transform_7(%arg0: i32) -> (i32, i32, i32) {
    %c0_i32 = arith.constant 0 : i32
    %c0_i32_0 = arith.constant 0 : i32
    %c0_i32_1 = arith.constant 0 : i32
    return %arg0, %c0_i32, %c0_i32_0 : i32, i32, i32
  }
}

module attributes {stable_mosaic.version = 11 : i64} {
  func.func @kernel(%arg0: i32, %arg1: i32, %arg2: memref<1x8x8x128xbf16, #tpu.memory_space<vmem>>, %arg3: memref<3x384x128xbf16, #tpu.memory_space<vmem>>, %arg4: memref<1x128xf32, #tpu.memory_space<vmem>>, %arg5: memref<1x128xf32, #tpu.memory_space<vmem>>, %arg6: memref<1x4x8x128xbf16, #tpu.memory_space<vmem>>, %arg7: memref<1x1x1x128xf32, #tpu.memory_space<vmem>>, %arg8: memref<1x1x1x128xf32, #tpu.memory_space<vmem>>, %arg9: memref<6x10x128xbf16, #tpu.memory_space<vmem>>) attributes {dimension_semantics = [#tpu.dimension_semantics<parallel>, #tpu.dimension_semantics<parallel>], iteration_bounds = array<i64: 2, 2>, scalar_prefetch = 0 : i64, scratch_operands = 1 : i64, tpu.core_type = #tpu.core_type<tc>, window_params = [{transform_indices = @transform_0, window_bounds = array<i64: 1, 8, 8, 128>}, {pipeline_mode = #tpu.pipeline_mode<synchronous>, transform_indices = @transform_1, window_bounds = array<i64: 3, 384, 128>}, {pipeline_mode = #tpu.pipeline_mode<synchronous>, transform_indices = @transform_2, window_bounds = array<i64: 1, 128>}, {pipeline_mode = #tpu.pipeline_mode<synchronous>, transform_indices = @transform_3, window_bounds = array<i64: 1, 128>}, {transform_indices = @transform_4, window_bounds = array<i64: 1, 4, 8, 128>}, {transform_indices = @transform_5, window_bounds = array<i64: 1, 1, 1, 128>}, {transform_indices = @transform_6, window_bounds = array<i64: 1, 1, 1, 128>}]} {
    %c4_i32 = arith.constant 4 : i32
    %0 = arith.muli %arg1, %c4_i32 : i32
    %cst = arith.constant 0.000000e+00 : bf16
    %1 = vector.broadcast %cst : bf16 to vector<6x10x128xbf16>
    %c0 = arith.constant 0 : index
    %c0_0 = arith.constant 0 : index
    %c0_1 = arith.constant 0 : index
    %2 = vector.load %arg9[%c0, %c0_0, %c0_1] : memref<6x10x128xbf16, #tpu.memory_space<vmem>>, vector<6x10x128xbf16>
    tpu.vector_store %arg9[%c0, %c0_0, %c0_1], %1 {strides = array<i32>} : memref<6x10x128xbf16, #tpu.memory_space<vmem>>, vector<6x10x128xbf16>,
    %c0_2 = arith.constant 0 : index
    %3 = arith.index_cast %0 : i32 to index
    %c0_3 = arith.constant 0 : index
    %c0_4 = arith.constant 0 : index
    %4 = vector.load %arg2[%c0_2, %3, %c0_3, %c0_4] : memref<1x8x8x128xbf16, #tpu.memory_space<vmem>>, vector<1x4x8x128xbf16>
    %5 = vector.shape_cast %4 : vector<1x4x8x128xbf16> to vector<4x8x128xbf16>
    %6 = arith.extf %5 : vector<4x8x128xbf16> to vector<4x8x128xf32>
    %c0_5 = arith.constant 0 : index
    %c0_6 = arith.constant 0 : index
    %7 = vector.load %arg4[%c0_5, %c0_6] : memref<1x128xf32, #tpu.memory_space<vmem>>, vector<1x128xf32>
    %8 = vector.shape_cast %7 : vector<1x128xf32> to vector<1x1x128xf32>
    %9 = vector.broadcast %8 : vector<1x1x128xf32> to vector<4x8x128xf32>
    %10 = arith.mulf %6, %9 : vector<4x8x128xf32>
    %c0_7 = arith.constant 0 : index
    %c0_8 = arith.constant 0 : index
    %11 = vector.load %arg5[%c0_7, %c0_8] : memref<1x128xf32, #tpu.memory_space<vmem>>, vector<1x128xf32>
    %12 = vector.shape_cast %11 : vector<1x128xf32> to vector<1x1x128xf32>
    %13 = vector.broadcast %12 : vector<1x1x128xf32> to vector<4x8x128xf32>
    %14 = arith.addf %10, %13 : vector<4x8x128xf32>
    %cst_9 = arith.constant 0.000000e+00 : f32
    %15 = vector.broadcast %cst_9 : f32 to vector<4x8x128xf32>
    %16 = arith.maximumf %14, %15 : vector<4x8x128xf32>
    %17 = arith.truncf %16 : vector<4x8x128xf32> to vector<4x8x128xbf16>
    %c1 = arith.constant 1 : index
    %c1_10 = arith.constant 1 : index
    %c0_11 = arith.constant 0 : index
    %18 = vector.load %arg9[%c1, %c1_10, %c0_11] : memref<6x10x128xbf16, #tpu.memory_space<vmem>>, vector<4x8x128xbf16>
    tpu.vector_store %arg9[%c1, %c1_10, %c0_11], %17 {strides = array<i32>} : memref<6x10x128xbf16, #tpu.memory_space<vmem>>, vector<4x8x128xbf16>,
    %c0_i32 = arith.constant 0 : i32
    %19 = arith.cmpi sgt, %arg1, %c0_i32 : i32
    %20 = arith.extui %19 : i1 to i32
    %c0_i32_12 = arith.constant 0 : i32
    %21 = arith.cmpi ne, %20, %c0_i32_12 : i32
    scf.if %21 {
      %c1_i32_49 = arith.constant 1 : i32
      %66 = arith.subi %0, %c1_i32_49 : i32
      %c0_50 = arith.constant 0 : index
      %67 = arith.index_cast %66 : i32 to index
      %c0_51 = arith.constant 0 : index
      %c0_52 = arith.constant 0 : index
      %68 = vector.load %arg2[%c0_50, %67, %c0_51, %c0_52] : memref<1x8x8x128xbf16, #tpu.memory_space<vmem>>, vector<1x1x8x128xbf16>
      %69 = vector.shape_cast %68 : vector<1x1x8x128xbf16> to vector<1x8x128xbf16>
      %70 = arith.extf %69 : vector<1x8x128xbf16> to vector<1x8x128xf32>
      %c0_53 = arith.constant 0 : index
      %c0_54 = arith.constant 0 : index
      %71 = vector.load %arg4[%c0_53, %c0_54] : memref<1x128xf32, #tpu.memory_space<vmem>>, vector<1x128xf32>
      %72 = vector.shape_cast %71 : vector<1x128xf32> to vector<1x1x128xf32>
      %73 = vector.broadcast %72 : vector<1x1x128xf32> to vector<1x8x128xf32>
      %74 = arith.mulf %70, %73 : vector<1x8x128xf32>
      %c0_55 = arith.constant 0 : index
      %c0_56 = arith.constant 0 : index
      %75 = vector.load %arg5[%c0_55, %c0_56] : memref<1x128xf32, #tpu.memory_space<vmem>>, vector<1x128xf32>
      %76 = vector.shape_cast %75 : vector<1x128xf32> to vector<1x1x128xf32>
      %77 = vector.broadcast %76 : vector<1x1x128xf32> to vector<1x8x128xf32>
      %78 = arith.addf %74, %77 : vector<1x8x128xf32>
      %cst_57 = arith.constant 0.000000e+00 : f32
      %79 = vector.broadcast %cst_57 : f32 to vector<1x8x128xf32>
      %80 = arith.maximumf %78, %79 : vector<1x8x128xf32>
      %81 = arith.truncf %80 : vector<1x8x128xf32> to vector<1x8x128xbf16>
      %c0_58 = arith.constant 0 : index
      %c1_59 = arith.constant 1 : index
      %c0_60 = arith.constant 0 : index
      %82 = vector.load %arg9[%c0_58, %c1_59, %c0_60] : memref<6x10x128xbf16, #tpu.memory_space<vmem>>, vector<1x8x128xbf16>
      tpu.vector_store %arg9[%c0_58, %c1_59, %c0_60], %81 {strides = array<i32>} : memref<6x10x128xbf16, #tpu.memory_space<vmem>>, vector<1x8x128xbf16>,
    } else {
    }
    %c1_i32 = arith.constant 1 : i32
    %22 = arith.cmpi slt, %arg1, %c1_i32 : i32
    %23 = arith.extui %22 : i1 to i32
    %c0_i32_13 = arith.constant 0 : i32
    %24 = arith.cmpi ne, %23, %c0_i32_13 : i32
    scf.if %24 {
      %c4_i32_49 = arith.constant 4 : i32
      %66 = arith.addi %0, %c4_i32_49 : i32
      %c0_50 = arith.constant 0 : index
      %67 = arith.index_cast %66 : i32 to index
      %c0_51 = arith.constant 0 : index
      %c0_52 = arith.constant 0 : index
      %68 = vector.load %arg2[%c0_50, %67, %c0_51, %c0_52] : memref<1x8x8x128xbf16, #tpu.memory_space<vmem>>, vector<1x1x8x128xbf16>
      %69 = vector.shape_cast %68 : vector<1x1x8x128xbf16> to vector<1x8x128xbf16>
      %70 = arith.extf %69 : vector<1x8x128xbf16> to vector<1x8x128xf32>
      %c0_53 = arith.constant 0 : index
      %c0_54 = arith.constant 0 : index
      %71 = vector.load %arg4[%c0_53, %c0_54] : memref<1x128xf32, #tpu.memory_space<vmem>>, vector<1x128xf32>
      %72 = vector.shape_cast %71 : vector<1x128xf32> to vector<1x1x128xf32>
      %73 = vector.broadcast %72 : vector<1x1x128xf32> to vector<1x8x128xf32>
      %74 = arith.mulf %70, %73 : vector<1x8x128xf32>
      %c0_55 = arith.constant 0 : index
      %c0_56 = arith.constant 0 : index
      %75 = vector.load %arg5[%c0_55, %c0_56] : memref<1x128xf32, #tpu.memory_space<vmem>>, vector<1x128xf32>
      %76 = vector.shape_cast %75 : vector<1x128xf32> to vector<1x1x128xf32>
      %77 = vector.broadcast %76 : vector<1x1x128xf32> to vector<1x8x128xf32>
      %78 = arith.addf %74, %77 : vector<1x8x128xf32>
      %cst_57 = arith.constant 0.000000e+00 : f32
      %79 = vector.broadcast %cst_57 : f32 to vector<1x8x128xf32>
      %80 = arith.maximumf %78, %79 : vector<1x8x128xf32>
      %81 = arith.truncf %80 : vector<1x8x128xf32> to vector<1x8x128xbf16>
      %c5 = arith.constant 5 : index
      %c1_58 = arith.constant 1 : index
      %c0_59 = arith.constant 0 : index
      %82 = vector.load %arg9[%c5, %c1_58, %c0_59] : memref<6x10x128xbf16, #tpu.memory_space<vmem>>, vector<1x8x128xbf16>
      tpu.vector_store %arg9[%c5, %c1_58, %c0_59], %81 {strides = array<i32>} : memref<6x10x128xbf16, #tpu.memory_space<vmem>>, vector<1x8x128xbf16>,
    } else {
    }
    %cst_14 = arith.constant 0.000000e+00 : f32
    %25 = vector.broadcast %cst_14 : f32 to vector<32x128xf32>
    %c0_15 = arith.constant 0 : index
    %c0_16 = arith.constant 0 : index
    %c0_17 = arith.constant 0 : index
    %26 = vector.load %arg9[%c0_15, %c0_16, %c0_17] : memref<6x10x128xbf16, #tpu.memory_space<vmem>>, vector<4x10x128xbf16>
    %27 = vector.extract_strided_slice %26 {offsets = [0, 0, 0], sizes = [4, 8, 128], strides = [1, 1, 1]} : vector<4x10x128xbf16> to vector<4x8x128xbf16>
    %28 = vector.extract_strided_slice %26 {offsets = [0, 1, 0], sizes = [4, 8, 128], strides = [1, 1, 1]} : vector<4x10x128xbf16> to vector<4x8x128xbf16>
    %29 = vector.extract_strided_slice %26 {offsets = [0, 2, 0], sizes = [4, 8, 128], strides = [1, 1, 1]} : vector<4x10x128xbf16> to vector<4x8x128xbf16>
    %30 = tpu.concatenate %27, %28, %29 in 2 : vector<4x8x128xbf16>, vector<4x8x128xbf16>, vector<4x8x128xbf16> -> vector<4x8x384xbf16>
    %31 = vector.shape_cast %30 : vector<4x8x384xbf16> to vector<32x384xbf16>
    %c0_18 = arith.constant 0 : index
    %c0_19 = arith.constant 0 : index
    %c0_20 = arith.constant 0 : index
    %32 = vector.load %arg3[%c0_18, %c0_19, %c0_20] : memref<3x384x128xbf16, #tpu.memory_space<vmem>>, vector<1x384x128xbf16>
    %33 = vector.shape_cast %32 : vector<1x384x128xbf16> to vector<384x128xbf16>
    %cst_21 = arith.constant dense<0.000000e+00> : vector<32x128xf32>
    %34 = tpu.matmul %31, %33, %cst_21 {dimension_numbers = #tpu.dot_dimension_numbers<[1], [0], [0], [1], [0, 0, 1, 1], [], []>} : vector<32x384xbf16>, vector<384x128xbf16>, vector<32x128xf32> -> vector<32x128xf32>
    %35 = arith.addf %25, %34 : vector<32x128xf32>
    %c1_22 = arith.constant 1 : index
    %c0_23 = arith.constant 0 : index
    %c0_24 = arith.constant 0 : index
    %36 = vector.load %arg9[%c1_22, %c0_23, %c0_24] : memref<6x10x128xbf16, #tpu.memory_space<vmem>>, vector<4x10x128xbf16>
    %37 = vector.extract_strided_slice %36 {offsets = [0, 0, 0], sizes = [4, 8, 128], strides = [1, 1, 1]} : vector<4x10x128xbf16> to vector<4x8x128xbf16>
    %38 = vector.extract_strided_slice %36 {offsets = [0, 1, 0], sizes = [4, 8, 128], strides = [1, 1, 1]} : vector<4x10x128xbf16> to vector<4x8x128xbf16>
    %39 = vector.extract_strided_slice %36 {offsets = [0, 2, 0], sizes = [4, 8, 128], strides = [1, 1, 1]} : vector<4x10x128xbf16> to vector<4x8x128xbf16>
    %40 = tpu.concatenate %37, %38, %39 in 2 : vector<4x8x128xbf16>, vector<4x8x128xbf16>, vector<4x8x128xbf16> -> vector<4x8x384xbf16>
    %41 = vector.shape_cast %40 : vector<4x8x384xbf16> to vector<32x384xbf16>
    %c1_25 = arith.constant 1 : index
    %c0_26 = arith.constant 0 : index
    %c0_27 = arith.constant 0 : index
    %42 = vector.load %arg3[%c1_25, %c0_26, %c0_27] : memref<3x384x128xbf16, #tpu.memory_space<vmem>>, vector<1x384x128xbf16>
    %43 = vector.shape_cast %42 : vector<1x384x128xbf16> to vector<384x128xbf16>
    %cst_28 = arith.constant dense<0.000000e+00> : vector<32x128xf32>
    %44 = tpu.matmul %41, %43, %cst_28 {dimension_numbers = #tpu.dot_dimension_numbers<[1], [0], [0], [1], [0, 0, 1, 1], [], []>} : vector<32x384xbf16>, vector<384x128xbf16>, vector<32x128xf32> -> vector<32x128xf32>
    %45 = arith.addf %35, %44 : vector<32x128xf32>
    %c2 = arith.constant 2 : index
    %c0_29 = arith.constant 0 : index
    %c0_30 = arith.constant 0 : index
    %46 = vector.load %arg9[%c2, %c0_29, %c0_30] : memref<6x10x128xbf16, #tpu.memory_space<vmem>>, vector<4x10x128xbf16>
    %47 = vector.extract_strided_slice %46 {offsets = [0, 0, 0], sizes = [4, 8, 128], strides = [1, 1, 1]} : vector<4x10x128xbf16> to vector<4x8x128xbf16>
    %48 = vector.extract_strided_slice %46 {offsets = [0, 1, 0], sizes = [4, 8, 128], strides = [1, 1, 1]} : vector<4x10x128xbf16> to vector<4x8x128xbf16>
    %49 = vector.extract_strided_slice %46 {offsets = [0, 2, 0], sizes = [4, 8, 128], strides = [1, 1, 1]} : vector<4x10x128xbf16> to vector<4x8x128xbf16>
    %50 = tpu.concatenate %47, %48, %49 in 2 : vector<4x8x128xbf16>, vector<4x8x128xbf16>, vector<4x8x128xbf16> -> vector<4x8x384xbf16>
    %51 = vector.shape_cast %50 : vector<4x8x384xbf16> to vector<32x384xbf16>
    %c2_31 = arith.constant 2 : index
    %c0_32 = arith.constant 0 : index
    %c0_33 = arith.constant 0 : index
    %52 = vector.load %arg3[%c2_31, %c0_32, %c0_33] : memref<3x384x128xbf16, #tpu.memory_space<vmem>>, vector<1x384x128xbf16>
    %53 = vector.shape_cast %52 : vector<1x384x128xbf16> to vector<384x128xbf16>
    %cst_34 = arith.constant dense<0.000000e+00> : vector<32x128xf32>
    %54 = tpu.matmul %51, %53, %cst_34 {dimension_numbers = #tpu.dot_dimension_numbers<[1], [0], [0], [1], [0, 0, 1, 1], [], []>} : vector<32x384xbf16>, vector<384x128xbf16>, vector<32x128xf32> -> vector<32x128xf32>
    %55 = arith.addf %45, %54 : vector<32x128xf32>
    %56 = vector.shape_cast %55 : vector<32x128xf32> to vector<1x4x8x128xf32>
    %57 = arith.truncf %56 : vector<1x4x8x128xf32> to vector<1x4x8x128xbf16>
    %c0_35 = arith.constant 0 : index
    %c0_36 = arith.constant 0 : index
    %c0_37 = arith.constant 0 : index
    %c0_38 = arith.constant 0 : index
    %58 = vector.load %arg6[%c0_35, %c0_36, %c0_37, %c0_38] : memref<1x4x8x128xbf16, #tpu.memory_space<vmem>>, vector<1x4x8x128xbf16>
    tpu.vector_store %arg6[%c0_35, %c0_36, %c0_37, %c0_38], %57 {strides = array<i32>} : memref<1x4x8x128xbf16, #tpu.memory_space<vmem>>, vector<1x4x8x128xbf16>,
    %cst_39 = arith.constant dense<0.000000e+00> : vector<128xf32>
    %59 = vector.multi_reduction <add>, %55, %cst_39 [0] : vector<32x128xf32> to vector<128xf32>
    %60 = vector.shape_cast %59 : vector<128xf32> to vector<1x1x1x128xf32>
    %c0_40 = arith.constant 0 : index
    %c0_41 = arith.constant 0 : index
    %c0_42 = arith.constant 0 : index
    %c0_43 = arith.constant 0 : index
    %61 = vector.load %arg7[%c0_40, %c0_41, %c0_42, %c0_43] : memref<1x1x1x128xf32, #tpu.memory_space<vmem>>, vector<1x1x1x128xf32>
    tpu.vector_store %arg7[%c0_40, %c0_41, %c0_42, %c0_43], %60 {strides = array<i32>} : memref<1x1x1x128xf32, #tpu.memory_space<vmem>>, vector<1x1x1x128xf32>,
    %62 = arith.mulf %55, %55 : vector<32x128xf32>
    %cst_44 = arith.constant dense<0.000000e+00> : vector<128xf32>
    %63 = vector.multi_reduction <add>, %62, %cst_44 [0] : vector<32x128xf32> to vector<128xf32>
    %64 = vector.shape_cast %63 : vector<128xf32> to vector<1x1x1x128xf32>
    %c0_45 = arith.constant 0 : index
    %c0_46 = arith.constant 0 : index
    %c0_47 = arith.constant 0 : index
    %c0_48 = arith.constant 0 : index
    %65 = vector.load %arg8[%c0_45, %c0_46, %c0_47, %c0_48] : memref<1x1x1x128xf32, #tpu.memory_space<vmem>>, vector<1x1x1x128xf32>
    tpu.vector_store %arg8[%c0_45, %c0_46, %c0_47, %c0_48], %64 {strides = array<i32>} : memref<1x1x1x128xf32, #tpu.memory_space<vmem>>, vector<1x1x1x128xf32>,
    return
  }
  func.func @transform_0(%arg0: i32, %arg1: i32) -> (i32, i32, i32, i32) {
    %c0_i32 = arith.constant 0 : i32
    %c0_i32_0 = arith.constant 0 : i32
    %c0_i32_1 = arith.constant 0 : i32
    %c0_i32_2 = arith.constant 0 : i32
    return %arg0, %c0_i32, %c0_i32_0, %c0_i32_1 : i32, i32, i32, i32
  }
  func.func @transform_1(%arg0: i32, %arg1: i32) -> (i32, i32, i32) {
    %c0_i32 = arith.constant 0 : i32
    %c0_i32_0 = arith.constant 0 : i32
    %c0_i32_1 = arith.constant 0 : i32
    %c0_i32_2 = arith.constant 0 : i32
    return %c0_i32, %c0_i32_0, %c0_i32_1 : i32, i32, i32
  }
  func.func @transform_2(%arg0: i32, %arg1: i32) -> (i32, i32) {
    %c0_i32 = arith.constant 0 : i32
    %c0_i32_0 = arith.constant 0 : i32
    %c0_i32_1 = arith.constant 0 : i32
    return %c0_i32, %c0_i32_0 : i32, i32
  }
  func.func @transform_3(%arg0: i32, %arg1: i32) -> (i32, i32) {
    %c0_i32 = arith.constant 0 : i32
    %c0_i32_0 = arith.constant 0 : i32
    %c0_i32_1 = arith.constant 0 : i32
    return %c0_i32, %c0_i32_0 : i32, i32
  }
  func.func @transform_4(%arg0: i32, %arg1: i32) -> (i32, i32, i32, i32) {
    %c0_i32 = arith.constant 0 : i32
    %c0_i32_0 = arith.constant 0 : i32
    %c0_i32_1 = arith.constant 0 : i32
    return %arg0, %arg1, %c0_i32, %c0_i32_0 : i32, i32, i32, i32
  }
  func.func @transform_5(%arg0: i32, %arg1: i32) -> (i32, i32, i32, i32) {
    %c0_i32 = arith.constant 0 : i32
    %c0_i32_0 = arith.constant 0 : i32
    %c0_i32_1 = arith.constant 0 : i32
    return %arg0, %arg1, %c0_i32, %c0_i32_0 : i32, i32, i32, i32
  }
  func.func @transform_6(%arg0: i32, %arg1: i32) -> (i32, i32, i32, i32) {
    %c0_i32 = arith.constant 0 : i32
    %c0_i32_0 = arith.constant 0 : i32
    %c0_i32_1 = arith.constant 0 : i32
    return %arg0, %arg1, %c0_i32, %c0_i32_0 : i32, i32, i32, i32
  }
}

module attributes {stable_mosaic.version = 11 : i64} {
  func.func @kernel(%arg0: i32, %arg1: memref<32x128xbf16, #tpu.memory_space<vmem>>, %arg2: memref<32x128xbf16, #tpu.memory_space<vmem>>, %arg3: memref<1x128xf32, #tpu.memory_space<vmem>>, %arg4: memref<1x128xf32, #tpu.memory_space<vmem>>, %arg5: memref<1x128xf32, #tpu.memory_space<vmem>>, %arg6: memref<1x128xf32, #tpu.memory_space<vmem>>, %arg7: memref<32x8xf32, #tpu.memory_space<vmem>>) attributes {dimension_semantics = [#tpu.dimension_semantics<parallel>], iteration_bounds = array<i64: 4>, scalar_prefetch = 0 : i64, scratch_operands = 0 : i64, tpu.core_type = #tpu.core_type<tc>, window_params = [{transform_indices = @transform_0, window_bounds = array<i64: 32, 128>}, {transform_indices = @transform_1, window_bounds = array<i64: 32, 128>}, {pipeline_mode = #tpu.pipeline_mode<synchronous>, transform_indices = @transform_2, window_bounds = array<i64: 1, 128>}, {pipeline_mode = #tpu.pipeline_mode<synchronous>, transform_indices = @transform_3, window_bounds = array<i64: 1, 128>}, {pipeline_mode = #tpu.pipeline_mode<synchronous>, transform_indices = @transform_4, window_bounds = array<i64: 1, 128>}, {pipeline_mode = #tpu.pipeline_mode<synchronous>, transform_indices = @transform_5, window_bounds = array<i64: 1, 128>}, {transform_indices = @transform_6, window_bounds = array<i64: 32, 8>}]} {
    %c0 = arith.constant 0 : index
    %c0_0 = arith.constant 0 : index
    %0 = vector.load %arg1[%c0, %c0_0] : memref<32x128xbf16, #tpu.memory_space<vmem>>, vector<32x128xbf16>
    %1 = arith.extf %0 : vector<32x128xbf16> to vector<32x128xf32>
    %c0_1 = arith.constant 0 : index
    %c0_2 = arith.constant 0 : index
    %2 = vector.load %arg3[%c0_1, %c0_2] : memref<1x128xf32, #tpu.memory_space<vmem>>, vector<1x128xf32>
    %3 = vector.broadcast %2 : vector<1x128xf32> to vector<32x128xf32>
    %4 = arith.mulf %1, %3 : vector<32x128xf32>
    %c0_3 = arith.constant 0 : index
    %c0_4 = arith.constant 0 : index
    %5 = vector.load %arg4[%c0_3, %c0_4] : memref<1x128xf32, #tpu.memory_space<vmem>>, vector<1x128xf32>
    %6 = vector.broadcast %5 : vector<1x128xf32> to vector<32x128xf32>
    %7 = arith.addf %4, %6 : vector<32x128xf32>
    %c0_5 = arith.constant 0 : index
    %c0_6 = arith.constant 0 : index
    %8 = vector.load %arg2[%c0_5, %c0_6] : memref<32x128xbf16, #tpu.memory_space<vmem>>, vector<32x128xbf16>
    %9 = arith.extf %8 : vector<32x128xbf16> to vector<32x128xf32>
    %c0_7 = arith.constant 0 : index
    %c0_8 = arith.constant 0 : index
    %10 = vector.load %arg5[%c0_7, %c0_8] : memref<1x128xf32, #tpu.memory_space<vmem>>, vector<1x128xf32>
    %11 = vector.broadcast %10 : vector<1x128xf32> to vector<32x128xf32>
    %12 = arith.mulf %9, %11 : vector<32x128xf32>
    %c0_9 = arith.constant 0 : index
    %c0_10 = arith.constant 0 : index
    %13 = vector.load %arg6[%c0_9, %c0_10] : memref<1x128xf32, #tpu.memory_space<vmem>>, vector<1x128xf32>
    %14 = vector.broadcast %13 : vector<1x128xf32> to vector<32x128xf32>
    %15 = arith.addf %12, %14 : vector<32x128xf32>
    %16 = arith.addf %7, %15 : vector<32x128xf32>
    %cst = arith.constant 0.000000e+00 : f32
    %17 = vector.broadcast %cst : f32 to vector<32x128xf32>
    %18 = arith.maximumf %16, %17 : vector<32x128xf32>
    %19 = vector.extract_strided_slice %18 {offsets = [0, 0], sizes = [32, 8], strides = [1, 1]} : vector<32x128xf32> to vector<32x8xf32>
    %c0_11 = arith.constant 0 : index
    %c0_12 = arith.constant 0 : index
    %20 = vector.load %arg7[%c0_11, %c0_12] : memref<32x8xf32, #tpu.memory_space<vmem>>, vector<32x8xf32>
    tpu.vector_store %arg7[%c0_11, %c0_12], %19 {strides = array<i32>} : memref<32x8xf32, #tpu.memory_space<vmem>>, vector<32x8xf32>,
    return
  }
  func.func @transform_0(%arg0: i32) -> (i32, i32) {
    %c0_i32 = arith.constant 0 : i32
    %c0_i32_0 = arith.constant 0 : i32
    return %arg0, %c0_i32 : i32, i32
  }
  func.func @transform_1(%arg0: i32) -> (i32, i32) {
    %c0_i32 = arith.constant 0 : i32
    %c0_i32_0 = arith.constant 0 : i32
    return %arg0, %c0_i32 : i32, i32
  }
  func.func @transform_2(%arg0: i32) -> (i32, i32) {
    %c0_i32 = arith.constant 0 : i32
    %c0_i32_0 = arith.constant 0 : i32
    %c0_i32_1 = arith.constant 0 : i32
    return %c0_i32, %c0_i32_0 : i32, i32
  }
  func.func @transform_3(%arg0: i32) -> (i32, i32) {
    %c0_i32 = arith.constant 0 : i32
    %c0_i32_0 = arith.constant 0 : i32
    %c0_i32_1 = arith.constant 0 : i32
    return %c0_i32, %c0_i32_0 : i32, i32
  }
  func.func @transform_4(%arg0: i32) -> (i32, i32) {
    %c0_i32 = arith.constant 0 : i32
    %c0_i32_0 = arith.constant 0 : i32
    %c0_i32_1 = arith.constant 0 : i32
    return %c0_i32, %c0_i32_0 : i32, i32
  }
  func.func @transform_5(%arg0: i32) -> (i32, i32) {
    %c0_i32 = arith.constant 0 : i32
    %c0_i32_0 = arith.constant 0 : i32
    %c0_i32_1 = arith.constant 0 : i32
    return %c0_i32, %c0_i32_0 : i32, i32
  }
  func.func @transform_6(%arg0: i32) -> (i32, i32) {
    %c0_i32 = arith.constant 0 : i32
    %c0_i32_0 = arith.constant 0 : i32
    return %arg0, %c0_i32 : i32, i32
  }
}

</mosaic_0001>

<bundles_post_ra>
// kernel: _lambda_.3
= control target key start
LH: loop header
LB: loop body
LE: loop exit
PB: predicated region body
PF: predicated region fallthrough
CT: control target
= control target key end

     0   :  { %s810_s24 = smov 0   ;;  %s879_s0 = inlined_call_operand.vmem [shape: bf16[128,36], index: 0, kind: input, shape index: {}]   ;;  %s880_s1 = inlined_call_operand.vmem [shape: bf16[36,256], index: 1, kind: input, shape index: {}]   ;;  %s881_s2 = inlined_call_operand.vmem [shape: bf16[128,128], index: 2, kind: output, shape index: {0}]   ;;  %s882_s3 = inlined_call_operand.vmem [shape: bf16[128,128], index: 3, kind: output, shape index: {1}]   ;;  %s883_s4 = inlined_call_operand.vmem [shape: f32[4,1,128], index: 4, kind: output, shape index: {2}]   ;;  %s884_s5 = inlined_call_operand.vmem [shape: f32[4,1,128], index: 5, kind: output, shape index: {3}]   ;;  %s885_s6 = inlined_call_operand.vmem [shape: f32[4,1,128], index: 6, kind: output, shape index: {4}]   ;;  %s886_s7 = inlined_call_operand.vmem [shape: f32[4,1,128], index: 7, kind: output, shape index: {5}]  }
   0x1 LB: > { %s816_s25 = sadd.s32 4294967295, %s768_s24   ;;  %p683_p0 = scmp.ge.s32.totalorder %s768_s24, 1  ;;  %s768_s24 = sphi %s810_s24, %s18_s24  }
   0x2   : > { %p249_p1 = scmp.lt.s32.totalorder %s768_s24, 5 }
   0x4   : > { %p250_p2 = pnand %p683_p0, %p249_p1 }
   0x5   : > { %s684_s28 = sshll.u32 (!%p250_p2), %s816_s25, 2  ;;  %p316_p4 = scmp.lt.s32.totalorder (!%p250_p2), %s816_s25, 3 }
   0x6   : > { %253 = sbr.rel (%p250_p2) target bundleno = 186 (0xba), region = 28  ;;  %p299_p3 = scmp.lt.s32.totalorder (!%p250_p2), %s684_s28, 15 }
   0xb   : > { %v337_v0 = vld [vmem:[%s880_s1 + $0x20] sm:$0x33]  ;;  %vm380_vm0 = vcmask 1041408   ;;  %v708_v5 = vld [vmem:[%s880_s1 + $0x10] sm:$0xf]  ;;  %s888_s28 = smov (!%p299_p3, %s684_s28), 15 }
   0xc   : > { %v361_v1 = vunpack.c.l.b16 %v337_v0  ;;  %v362_v2 = vunpack.c.h.b16 %v337_v0  ;;  %v725_v6 = vld [vmem:[%s880_s1 + $0x14] sm:$0xf0]  ;;  %v724_v7 = vld [vmem:[%s880_s1 + $0x14] sm:$0xf]  ;;  %v710_v8 = vld [vmem:[%s880_s1 + $0x18] sm:$0xf0] }
   0xd   : > { %v709_v11 = vor.u32 %v725_v6, %v708_v5  ;;  %v713_v12 = vor.u32 %v724_v7, %v710_v8  ;;  %v700_v13 = vld [vmem:[%s880_s1] sm:$0xf]  ;;  %v723_v14 = vld [vmem:[%s880_s1 + $0x4] sm:$0xf0]  ;;  %s842_s18 = sshll.u32 %s888_s28, 2  ;;  %vm373_vm1 = vcmask 293888  }
   0xe   : > { %v367_v3 = vpack.c.b16 %v361_v1, %v361_v1  ;;  %v368_v4 = vpack.c.b16 %v362_v2, %v362_v2  ;;  %v722_v15 = vld [vmem:[%s880_s1 + $0x4] sm:$0xf]  ;;  %v702_v16 = vld [vmem:[%s880_s1 + $0x8] sm:$0xf0]  ;;  %v701_v17 = vor.u32 %v723_v14, %v700_v13  ;;  %s302_s27 = scalar_lea.vmem %s879_s0, %s842_s18  ;;  %s308_s30 = scalar_lea.vmem %s881_s2, %s842_s18 }
   0xf   : > { %v705_v18 = vor.u32 %v722_v15, %v702_v16  ;;  %v720_v19 = vld [vmem:[%s302_s27] sm:$0xff]  ;;  %v721_v20 = vld [vmem:[%s302_s27 + $0x8] sm:$0xff]  ;;  %s314_s10 = scalar_lea.vmem %s882_s3, %s842_s18  ;;  %s890_s25 = smov (!%p316_p4, %s816_s25), 3 }
  0x10   : > { %v382_v9 = vsel %vm380_vm0, %v367_v3, 0  ;;  %v385_v10 = vsel %vm380_vm0, %v368_v4, 0  ;;  %s318_s13 = scalar_lea.vmem %s883_s4, %s890_s25  ;;  %s324_s16 = scalar_lea.vmem %s885_s6, %s890_s25 }
  0x11   : > { %392 = vmatpush.bf16.msra.mxu0 %v382_v9  ;;  %748 = vmatpush.bf16.msra.mxu2 %v382_v9  ;;  %s321_s19 = scalar_lea.vmem %s884_s5, %s890_s25  ;;  %s327_s22 = scalar_lea.vmem %s886_s7, %s890_s25 }
  0x12   : > { %411 = vmatpush.bf16.msra.mxu1 %v385_v10  ;;  %751 = vmatpush.bf16.msra.mxu3 %v385_v10 }
  0x15   : > { %393 = vmatpush.bf16.msra.mxu0 %v709_v11  ;;  %749 = vmatpush.bf16.msra.mxu2 %v709_v11 }
  0x16   : > { %412 = vmatpush.bf16.msra.mxu1 %v713_v12  ;;  %752 = vmatpush.bf16.msra.mxu3 %v713_v12 }
  0x19   : > { %394 = vmatpush.bf16.msra.mxu0 %v701_v17  ;;  %750 = vmatpush.bf16.msra.mxu2 %v701_v17 }
  0x1a   : > { %413 = vmatpush.bf16.msra.mxu1 %v705_v18  ;;  %753 = vmatpush.bf16.msra.mxu3 %v705_v18 }
  0x1c   : > { %714 = vmatmul.msk.bf16.vlgmr.msra.gmra.mxu0 %vm373_vm1, %v720_v19  ;;  %715 = vmatmul.msk.bf16.vlgmr.msra.gmra.mxu2 %vm373_vm1, %v721_v20 }
  0x1d   : > { %716 = vmatmul.msk.bf16.vlgmr.msra.gmra.mxu1 %vm373_vm1, %v720_v19  ;;  %717 = vmatmul.msk.bf16.vlgmr.msra.gmra.mxu3 %vm373_vm1, %v721_v20 }
  0x99   : > { %v396_v21 = vpop.f32.mrf.mxu0 }
  0x9a   : > { %v415_v22 = vpop.f32.mrf.mxu1  ;;  %v451_v26 = vmul.f32 %v396_v21, %v396_v21 }
  0x9b   : > { %v475_v31 = vmul.f32 %v415_v22, %v415_v22 }
  0x9f   : > { %v401_v23 = vpop.f32.mrf.mxu2 }
  0xa0   : > { %v420_v24 = vpop.f32.mrf.mxu3  ;;  %v453_v37 = vmul.f32 %v401_v23, %v401_v23 }
  0xa1   : > { %v398_v25 = vpop.f32.mrf.mxu0  ;;  %v477_v39 = vmul.f32 %v420_v24, %v420_v24 }
  0xa2   : > { %v729_v27 = vpack.c.bf16 %v398_v25, %v396_v21  ;;  %v441_v28 = vadd.f32 %v398_v25, %v396_v21  ;;  %v452_v29 = vmul.f32 %v398_v25, %v398_v25  ;;  %v417_v30 = vpop.f32.mrf.mxu1 }
  0xa3   : > { %v739_v32 = vpack.c.bf16 %v417_v30, %v415_v22  ;;  %v465_v33 = vadd.f32 %v417_v30, %v415_v22  ;;  %v476_v34 = vmul.f32 %v417_v30, %v417_v30 }
  0xa4   : > { %730 = vst [vmem:[%s308_s30] sm:$0xff] %v729_v27   ;;  %v455_v35 = vadd.f32 %v452_v29, %v451_v26  ;;  %v442_v38 = vadd.f32 %v441_v28, %v401_v23 }
  0xa5   : > { %740 = vst [vmem:[%s314_s10] sm:$0xff] %v739_v32   ;;  %v479_v36 = vadd.f32 %v476_v34, %v475_v31  ;;  %v466_v41 = vadd.f32 %v465_v33, %v420_v24 }
  0xa6   : > { %v456_v45 = vadd.f32 %v455_v35, %v453_v37 }
  0xa7   : > { %v403_v40 = vpop.f32.mrf.mxu2  ;;  %v480_v50 = vadd.f32 %v479_v36, %v477_v39 }
  0xa8   : > { %v734_v42 = vpack.c.bf16 %v403_v40, %v401_v23  ;;  %v443_v43 = vadd.f32 %v442_v38, %v403_v40  ;;  %v454_v44 = vmul.f32 %v403_v40, %v403_v40  ;;  %v422_v46 = vpop.f32.mrf.mxu3 }
  0xa9   : > { %v744_v47 = vpack.c.bf16 %v422_v46, %v420_v24  ;;  %v467_v48 = vadd.f32 %v466_v41, %v422_v46  ;;  %v478_v49 = vmul.f32 %v422_v46, %v422_v46 }
  0xaa   : > { %746 = vst [vmem:[%s308_s30 + $0x8] sm:$0xff] %v734_v42   ;;  %v444_v51 = vrot.slane %v443_v43, 4  ;;  %v457_v52 = vadd.f32 %v456_v45, %v454_v44 }
  0xab   : > { %747 = vst [vmem:[%s314_s10 + $0x8] sm:$0xff] %v744_v47   ;;  %v468_v53 = vrot.slane %v467_v48, 4  ;;  %v481_v54 = vadd.f32 %v480_v50, %v478_v49 }
  0xac   : > { %v445_v55 = vadd.f32 %v444_v51, %v443_v43  ;;  %v458_v56 = vrot.slane %v457_v52, 4 }
  0xad   : > { %v469_v57 = vadd.f32 %v468_v53, %v467_v48  ;;  %v482_v58 = vrot.slane %v481_v54, 4 }
  0xae   : > { %v446_v59 = vrot.slane %v445_v55, 2  ;;  %v459_v60 = vadd.f32 %v458_v56, %v457_v52 }
  0xaf   : > { %v470_v61 = vrot.slane %v469_v57, 2  ;;  %v483_v62 = vadd.f32 %v482_v58, %v481_v54 }
  0xb0   : > { %v447_v63 = vadd.f32 %v446_v59, %v445_v55  ;;  %v460_v0 = vrot.slane %v459_v60, 2 }
  0xb1   : > { %v471_v1 = vadd.f32 %v470_v61, %v469_v57  ;;  %v484_v2 = vrot.slane %v483_v62, 2 }
  0xb2   : > { %v448_v3 = vrot.slane %v447_v63, 1  ;;  %v461_v4 = vadd.f32 %v460_v0, %v459_v60 }
  0xb3   : > { %v472_v5 = vrot.slane %v471_v1, 1  ;;  %v485_v6 = vadd.f32 %v484_v2, %v483_v62 }
  0xb4   : > { %v449_v7 = vadd.f32 %v448_v3, %v447_v63  ;;  %v462_v8 = vrot.slane %v461_v4, 1 }
  0xb5   : > { %v473_v9 = vadd.f32 %v472_v5, %v471_v1  ;;  %v486_v10 = vrot.slane %v485_v6, 1 }
  0xb6   : > { %450 = vst [vmem:[%s318_s13] sm:$0x1] %v449_v7  ;;  %v463_v11 = vadd.f32 %v462_v8, %v461_v4 }
  0xb7   : > { %474 = vst [vmem:[%s324_s16] sm:$0x1] %v473_v9  ;;  %v487_v12 = vadd.f32 %v486_v10, %v485_v6 }
  0xb8   : > { %464 = vst [vmem:[%s321_s19] sm:$0x1] %v463_v11 }
  0xb9   : > { %488 = vst [vmem:[%s327_s22] sm:$0x1] %v487_v12 }
  0xba PF: > { %s18_s24 = sadd.s32 1, %s768_s24  }
  0xbb   : > { %p15_p5 = scmp.ge.s32.totalorder %s18_s24, 6  }
  0xbd   :  { %17 = sbr.rel (!%p15_p5) target bundleno = 1 (0x1), region = 118 }

// kernel: _lambda_.5
= control target key start
LH: loop header
LB: loop body
LE: loop exit
PB: predicated region body
PF: predicated region fallthrough
CT: control target
= control target key end

     0   :  { %s492_s21 = smov 0   ;;  %s528_s0 = inlined_call_operand.vmem [shape: bf16[128,128], index: 0, kind: input, shape index: {}]   ;;  %s529_s1 = inlined_call_operand.vmem [shape: bf16[128,128], index: 1, kind: input, shape index: {}]   ;;  %s530_s2 = inlined_call_operand.vmem [shape: f32[1,128], index: 2, kind: input, shape index: {}]   ;;  %s531_s3 = inlined_call_operand.vmem [shape: f32[1,128], index: 3, kind: input, shape index: {}]   ;;  %s532_s4 = inlined_call_operand.vmem [shape: f32[1,128], index: 4, kind: input, shape index: {}]   ;;  %s533_s5 = inlined_call_operand.vmem [shape: f32[1,128], index: 5, kind: input, shape index: {}]   ;;  %s534_s6 = inlined_call_operand.vmem [shape: f32[128,8], index: 6, kind: output, shape index: {}]  }
   0x1 LB: > { %s406_s22 = sadd.s32 4294967295, %s455_s21   ;;  %p410_p0 = scmp.ge.s32.totalorder %s455_s21, 1  ;;  %s455_s21 = sphi %s492_s21, %s16_s21  }
   0x2   : > { %p224_p1 = scmp.lt.s32.totalorder %s455_s21, 5 }
   0x4   : > { %p225_p2 = pnand %p410_p0, %p224_p1 }
   0x5   : > { %s411_s23 = sshll.u32 (!%p225_p2), %s406_s22, 2 }
   0x6   : > { %228 = sbr.rel (%p225_p2) target bundleno = 30 (0x1e), region = 44  ;;  %p260_p3 = scmp.lt.s32.totalorder (!%p225_p2), %s411_s23, 15 }
   0xb   : > { %s536_s23 = smov (!%p260_p3, %s411_s23), 15  ;;  %v445_v0 = vld [vmem:[%s530_s2] ss:$0 sm:$0xff]  ;;  %vm333_vm0 = vcmask 64512  }
   0xc   : > { %s412_s24 = sshll.u32 %s536_s23, 2  ;;  %v447_v1 = vld [vmem:[%s532_s4] ss:$0 sm:$0xff]  ;;  %s416_s15 = sshll.u32 %s536_s23, 3 }
   0xd   : > { %s263_s27 = scalar_lea.vmem %s528_s0, %s412_s24  ;;  %s269_s30 = scalar_lea.vmem %s529_s1, %s412_s24  ;;  %v446_v6 = vld [vmem:[%s531_s3] ss:$0 sm:$0xff] }
   0xe   : > { %v420_v2 = vld [vmem:[%s263_s27] sm:$0xff]   ;;  %v435_v3 = vld [vmem:[%s263_s27 + $0x8] sm:$0xff]   ;;  %s275_s18 = scalar_lea.vmem %s534_s6, %s416_s15 }
   0xf   : > { %v428_v4 = vld [vmem:[%s269_s30] sm:$0xff]   ;;  %v421_v5 = vunpack.c.l.bf16 %v420_v2  ;;  %v436_v8 = vld [vmem:[%s269_s30 + $0x8] sm:$0xff]   ;;  %v422_v10 = vunpack.c.h.bf16 %v420_v2  ;;  %v425_v12 = vunpack.c.l.bf16 %v435_v3  ;;  %v426_v14 = vunpack.c.h.bf16 %v435_v3 }
  0x10   : > { %v429_v7 = vunpack.c.l.bf16 %v428_v4  ;;  %v448_v9 = vld [vmem:[%s533_s5] ss:$0 sm:$0xff]  ;;  %v430_v11 = vunpack.c.h.bf16 %v428_v4  ;;  %v433_v13 = vunpack.c.l.bf16 %v436_v8  ;;  %v434_v15 = vunpack.c.h.bf16 %v436_v8 }
  0x11   : > { %v289_v16 = vmul.f32 %v445_v0, %v421_v5  ;;  %v290_v18 = vmul.f32 %v445_v0, %v422_v10  ;;  %v291_v20 = vmul.f32 %v445_v0, %v425_v12  ;;  %v292_v22 = vmul.f32 %v445_v0, %v426_v14 }
  0x12   : > { %v313_v17 = vmul.f32 %v447_v1, %v429_v7  ;;  %v314_v19 = vmul.f32 %v447_v1, %v430_v11  ;;  %v315_v21 = vmul.f32 %v447_v1, %v433_v13  ;;  %v316_v23 = vmul.f32 %v447_v1, %v434_v15 }
  0x13   : > { %v297_v24 = vadd.f32 %v446_v6, %v289_v16  ;;  %v298_v26 = vadd.f32 %v446_v6, %v290_v18  ;;  %v299_v28 = vadd.f32 %v446_v6, %v291_v20  ;;  %v300_v30 = vadd.f32 %v446_v6, %v292_v22 }
  0x14   : > { %v321_v25 = vadd.f32 %v448_v9, %v313_v17  ;;  %v322_v27 = vadd.f32 %v448_v9, %v314_v19  ;;  %v323_v29 = vadd.f32 %v448_v9, %v315_v21  ;;  %v324_v31 = vadd.f32 %v448_v9, %v316_v23 }
  0x16   : > { %v325_v32 = vadd.f32 %v321_v25, %v297_v24  ;;  %v326_v33 = vadd.f32 %v322_v27, %v298_v26  ;;  %v327_v34 = vadd.f32 %v323_v29, %v299_v28  ;;  %v328_v35 = vadd.f32 %v324_v31, %v300_v30 }
  0x18   : > { %v329_v36 = vmax.f32 %v325_v32, 0.0  ;;  %v330_v37 = vmax.f32 %v326_v33, 0.0  ;;  %v331_v38 = vmax.f32 %v327_v34, 0.0  ;;  %v332_v39 = vmax.f32 %v328_v35, 0.0 }
  0x1a   : > { %334 = vst.msk [vmem:[%s275_s18] sm:$0xff] %vm333_vm0, %v329_v36 }
  0x1b   : > { %335 = vst.msk [vmem:[%s275_s18 + $0x8] sm:$0xff] %vm333_vm0, %v330_v37 }
  0x1c   : > { %336 = vst.msk [vmem:[%s275_s18 + $0x10] sm:$0xff] %vm333_vm0, %v331_v38 }
  0x1d   : > { %337 = vst.msk [vmem:[%s275_s18 + $0x18] sm:$0xff] %vm333_vm0, %v332_v39 }
  0x1e PF: > { %s16_s21 = sadd.s32 1, %s455_s21  }
  0x1f   : > { %p13_p4 = scmp.ge.s32.totalorder %s16_s21, 6  }
  0x21   :  { %15 = sbr.rel (!%p13_p4) target bundleno = 1 (0x1), region = 77 }

// kernel: _lambda_.4
= control target key start
LH: loop header
LB: loop body
LE: loop exit
PB: predicated region body
PF: predicated region fallthrough
CT: control target
= control target key end

     0   :  { %s2339_s21 = smov 0   ;;  %s2341_s22 = smov 0   ;;  %s2820_s0 = inlined_call_operand.vmem [shape: bf16[2,8,8,128], index: 0, kind: input, shape index: {}]   ;;  %s2821_s1 = inlined_call_operand.vmem [shape: bf16[3,384,128], index: 1, kind: input, shape index: {}]   ;;  %s2822_s2 = inlined_call_operand.vmem [shape: f32[1,128], index: 2, kind: input, shape index: {}]   ;;  %s2823_s3 = inlined_call_operand.vmem [shape: f32[1,128], index: 3, kind: input, shape index: {}]   ;;  %s2824_s4 = inlined_call_operand.vmem [shape: bf16[2,8,8,128], index: 4, kind: output, shape index: {0}]   ;;  %s2825_s5 = inlined_call_operand.vmem [shape: f32[2,2,1,128], index: 5, kind: output, shape index: {1}]   ;;  %s2826_s6 = inlined_call_operand.vmem [shape: f32[2,2,1,128], index: 6, kind: output, shape index: {2}]  }
   0x1   :  { %s2343_s23 = smov 0   ;;  %s2345_s24 = smov 0  }
   0x2   :  { %s2347_s25 = smov 0  }
   0x3 LB: > { %s26_s26 = sadd.s32 1, %s2293_s23  ;;  %s29_s27 = sadd.s32 1, %s2297_s24  ;;  %s2301_s25 = sphi %s2347_s25, %s17_s25   ;;  %s2297_s24 = sphi %s2345_s24, %s2834_s24   ;;  %s2293_s23 = sphi %s2343_s23, %s2833_s23   ;;  %s2289_s22 = sphi %s2341_s22, %s2832_s22   ;;  %s2285_s21 = sphi %s2339_s21, %s2831_s21  }
   0x4   : > { %p27_p0 = scmp.ge.s32.totalorder %s26_s26, 2  ;;  %p1710_p1 = scmp.ge.s32.totalorder %s2301_s25, 1 }
   0x5   : > { %p235_p2 = scmp.lt.s32.totalorder %s2301_s25, 5 }
   0x6   : > { %s2836_s26 = smov (%p27_p0, %s26_s26), 0  ;;  %s2838_s27 = smov (!%p27_p0, %s29_s27), %s2297_s24 }
   0x7   : > { %p236_p3 = pnand %p1710_p1, %p235_p2  ;;  %p31_p4 = scmp.ge.s32.totalorder %s2838_s27, 2 }
   0x8   : > { %p283_p5 = scmp.lt.s32.totalorder (!%p236_p3), %s2289_s22, 1  ;;  %s2372_s28 = sshll.u32 (!%p236_p3), %s2285_s21, 2 }
   0x9   : > { %s2840_s27 = smov (%p31_p4, %s2838_s27), 0  ;;  %239 = sbr.rel (%p236_p3) target bundleno = 349 (0x15d), region = 36 }
   0xa   : > { %p291_p6 = scmp.lt.s32.totalorder (!%p236_p3), %s2372_s28, 7  ;;  %p300_p7 = scmp.lt.s32.totalorder (!%p236_p3), %s2285_s21, 1 }
   0xb   : > { %s2114_s17 = sshll.u32 (!%p236_p3), %s2285_s21, 4  ;;  %p1720_p8 = scmp.le.s32.totalorder (!%p236_p3), %s2285_s21, 0 }
   0xe   : > { %v2303_v0 = vmov 0   ;;  %s2842_s22 = smov (!%p283_p5, %s2289_s22), 1  ;;  %v2257_v1 = vld [vmem:[%s2822_s2] ss:$0 sm:$0xff]  ;;  %vm401_vm0 = vcmask 1043456   ;;  %vm407_vm2 = vcmask 1040384  }
   0xf   : > { %316 = vst [vmem:[#allocation2 + $0x8] sm:$0xf] %v2303_v0  ;;  %s292_s29 = scalar_select %p291_p6, %s2372_s28, 7  ;;  %v2258_v5 = vld [vmem:[%s2823_s3] ss:$0 sm:$0xff] }
  0x10   : > { %314 = vst [vmem:[#allocation2] sm:$0xf] %v2303_v0  ;;  %s2113_s30 = sshll.u32 %s2842_s22, 5  ;;  %s1714_s7 = sshll.u32 %s2842_s22, 3  ;;  %vm402_vm1 = vsmask.f32 7938 }
  0x11   : > { %315 = vst [vmem:[#allocation2 + $0x4] sm:$0x1] %v2303_v0  ;;  %s2380_s10 = scalar_lea.vmem %s2820_s0, %s2113_s30  ;;  %s294_s11 = sadd.s32 %s1714_s7, %s292_s29  ;;  %vm408_vm3 = vsmask.f32 256  ;;  %vm2412_vm4 = vmand %vm401_vm0, %vm402_vm1 }
  0x12   : > { %317 = vst [vmem:[#allocation2 + $0xc] sm:$0x1] %v2303_v0  ;;  %s1715_s12 = sshll.u32 %s294_s11, 2  ;;  %s1716_s13 = sshll.u32 %s2842_s22, 1  ;;  %vm2416_vm5 = vmand %vm407_vm2, %vm408_vm3 }
  0x13   : > { %318 = vst [vmem:[#allocation2 + $0x10] sm:$0xf] %v2303_v0  ;;  %s2385_s16 = scalar_lea.vmem %s2824_s4, %s1715_s12  ;;  %s2392_s19 = scalar_lea.vmem %s2380_s10, %s2114_s17 }
  0x14   : > { %319 = vst [vmem:[#allocation2 + $0x14] sm:$0x1] %v2303_v0  ;;  %s301_s18 = scalar_select %p300_p7, %s2285_s21, 1  ;;  %v2189_v2 = vld [vmem:[%s2392_s19] sm:$0xff]   ;;  %v2206_v3 = vld [vmem:[%s2392_s19 + $0x8] sm:$0xff]  }
  0x15   : > { %320 = vst [vmem:[#allocation2 + $0x18] sm:$0xf] %v2303_v0  ;;  %v2190_v4 = vunpack.c.l.bf16 %v2189_v2  ;;  %v2191_v6 = vunpack.c.h.bf16 %v2189_v2  ;;  %v2194_v7 = vunpack.c.l.bf16 %v2206_v3  ;;  %v2195_v8 = vunpack.c.h.bf16 %v2206_v3 }
  0x16   : > { %321 = vst [vmem:[#allocation2 + $0x1c] sm:$0x1] %v2303_v0  ;;  %s2397_s22 = sadd.s32 %s1716_s13, %s301_s18  ;;  %v404_v34 = vld [vmem:[#allocation2 + $0x8] sm:$0xf]  ;;  %s1721_s13 = sadd.s32 (!%p1720_p8), 4294967295, %s2372_s28 }
  0x17   : > { %322 = vst [vmem:[#allocation2 + $0x20] sm:$0xf] %v2303_v0  ;;  %s304_s8 = scalar_lea.vmem %s2825_s5, %s2397_s22  ;;  %s311_s12 = scalar_lea.vmem %s2826_s6, %s2397_s22  ;;  %v340_v9 = vmul.f32 %v2257_v1, %v2190_v4  ;;  %v341_v10 = vmul.f32 %v2257_v1, %v2191_v6  ;;  %v342_v11 = vmul.f32 %v2257_v1, %v2194_v7  ;;  %v343_v12 = vmul.f32 %v2257_v1, %v2195_v8 }
  0x18   : > { %323 = vst [vmem:[#allocation2 + $0x24] sm:$0x1] %v2303_v0  ;;  %s1722_s17 = sshll.u32 (!%p1720_p8), %s1721_s13, 2 }
  0x19   : > { %324 = vst [vmem:[#allocation2 + $0x28] sm:$0xf] %v2303_v0  ;;  %v348_v13 = vadd.f32 %v2258_v5, %v340_v9  ;;  %v349_v14 = vadd.f32 %v2258_v5, %v341_v10  ;;  %v350_v15 = vadd.f32 %v2258_v5, %v342_v11  ;;  %v351_v16 = vadd.f32 %v2258_v5, %v343_v12  ;;  %v410_v38 = vld [vmem:[#allocation2 + $0xc] sm:$0x1]  ;;  %s437_s18 = scalar_lea.vmem (!%p1720_p8), %s2380_s10, %s1722_s17 }
  0x1a   : > { %325 = vst [vmem:[#allocation2 + $0x2c] sm:$0x1] %v2303_v0  ;;  %v413_v39 = vld [vmem:[#allocation2 + $0x10] sm:$0xf] }
  0x1b   : > { %v352_v17 = vmax.f32 %v348_v13, 0.0  ;;  %v353_v18 = vmax.f32 %v349_v14, 0.0  ;;  %v354_v19 = vmax.f32 %v350_v15, 0.0  ;;  %v355_v20 = vmax.f32 %v351_v16, 0.0  ;;  %v416_v46 = vld [vmem:[#allocation2 + $0x14] sm:$0x1] }
  0x1c   : > { %v419_v48 = vld [vmem:[#allocation2 + $0x18] sm:$0xf] }
  0x1d   : > { %v356_v21 = vpack.c.bf16 %v352_v17, %v352_v17  ;;  %v357_v22 = vpack.c.bf16 %v353_v18, %v353_v18  ;;  %v358_v23 = vpack.c.bf16 %v354_v19, %v354_v19  ;;  %v359_v24 = vpack.c.bf16 %v355_v20, %v355_v20  ;;  %v422_v53 = vld [vmem:[#allocation2 + $0x1c] sm:$0x1] }
  0x1e   : > { %v425_v56 = vld [vmem:[#allocation2 + $0x20] sm:$0xf] }
  0x1f   : > { %v361_v25 = vshrl.u32 %v356_v21, 16  ;;  %v364_v26 = vshll.u32 %v356_v21, 16  ;;  %v369_v27 = vshrl.u32 %v357_v22, 16  ;;  %v372_v28 = vshll.u32 %v357_v22, 16  ;;  %v428_v59 = vld [vmem:[#allocation2 + $0x24] sm:$0x1] }
  0x20   : > { %v377_v29 = vshrl.u32 %v358_v23, 16  ;;  %v380_v30 = vshll.u32 %v358_v23, 16  ;;  %v385_v31 = vshrl.u32 %v359_v24, 16  ;;  %v388_v36 = vshll.u32 %v359_v24, 16 }
  0x21   : > { %v363_v32 = vrot.slane %v361_v25, 7  ;;  %v371_v35 = vrot.slane %v369_v27, 7 }
  0x22   : > { %v379_v40 = vrot.slane %v377_v29, 7  ;;  %v387_v41 = vrot.slane %v385_v31, 7 }
  0x23   : > { %v366_v42 = vor.u32 %v364_v26, %v363_v32  ;;  %v367_v43 = vrot.slane %v363_v32, 4  ;;  %v374_v44 = vor.u32 %v372_v28, %v371_v35  ;;  %v375_v45 = vrot.slane %v371_v35, 4 }
  0x24   : > { %v382_v47 = vor.u32 %v380_v30, %v379_v40  ;;  %v383_v49 = vrot.slane %v379_v40, 4  ;;  %v390_v54 = vor.u32 %v388_v36, %v387_v41  ;;  %v391_v57 = vrot.slane %v387_v41, 4 }
  0x25   : > { %v405_v50 = vsel %vm2412_vm4, %v366_v42, %v404_v34  ;;  %v411_v51 = vsel %vm2416_vm5, %v367_v43, %v410_v38  ;;  %v414_v52 = vsel %vm2412_vm4, %v374_v44, %v413_v39  ;;  %v417_v55 = vsel %vm2416_vm5, %v375_v45, %v416_v46 }
  0x26   : > { %406 = vst [vmem:[#allocation2 + $0x8] sm:$0xf] %v405_v50  ;;  %v420_v58 = vsel %vm2412_vm4, %v382_v47, %v419_v48  ;;  %v423_v60 = vsel %vm2416_vm5, %v383_v49, %v422_v53  ;;  %v426_v61 = vsel %vm2412_vm4, %v390_v54, %v425_v56  ;;  %v429_v62 = vsel %vm2416_vm5, %v391_v57, %v428_v59 }
  0x27   : > { %412 = vst [vmem:[#allocation2 + $0xc] sm:$0x1] %v411_v51 }
  0x28   : > { %415 = vst [vmem:[#allocation2 + $0x10] sm:$0xf] %v414_v52 }
  0x29   : > { %418 = vst [vmem:[#allocation2 + $0x14] sm:$0x1] %v417_v55  ;;  %434 = sbr.rel (%p1720_p8) target bundleno = 67 (0x43), region = 40 }
  0x2a   : > { %421 = vst [vmem:[#allocation2 + $0x18] sm:$0xf] %v420_v58 }
  0x2b   : > { %424 = vst [vmem:[#allocation2 + $0x1c] sm:$0x1] %v423_v60 }
  0x2c   : > { %427 = vst [vmem:[#allocation2 + $0x20] sm:$0xf] %v426_v61 }
  0x2d   : > { %430 = vst [vmem:[#allocation2 + $0x24] sm:$0x1] %v429_v62 }
  0x2e   : > { %v2259_v63 = vld [vmem:[%s2822_s2] ss:$0 sm:$0xff]  ;;  %v465_v11 = vld [vmem:[#allocation2 + $0x4] sm:$0x1] }
  0x2f   : > { %v438_v0 = vld [vmem:[%s437_s18] sm:$0xf] }
  0x30   : > { %v439_v1 = vunpack.c.l.bf16 %v438_v0  ;;  %v2260_v2 = vld [vmem:[%s2823_s3] ss:$0 sm:$0xff] }
  0x31   : > { %v462_v10 = vld [vmem:[#allocation2] sm:$0xf] }
  0x32   : > { %v444_v3 = vmul.f32 %v2259_v63, %v439_v1 }
  0x34   : > { %v449_v4 = vadd.f32 %v2260_v2, %v444_v3 }
  0x36   : > { %v450_v5 = vmax.f32 %v449_v4, 0.0 }
  0x38   : > { %v451_v6 = vpack.c.bf16 %v450_v5, %v450_v5 }
  0x3a   : > { %v453_v7 = vshrl.u32 %v451_v6, 16  ;;  %v456_v8 = vshll.u32 %v451_v6, 16 }
  0x3c   : > { %v455_v9 = vrot.slane %v453_v7, 7 }
  0x3e   : > { %v458_v12 = vor.u32 %v456_v8, %v455_v9  ;;  %v459_v13 = vrot.slane %v455_v9, 4 }
  0x40   : > { %v463_v14 = vsel %vm2412_vm4, %v458_v12, %v462_v10  ;;  %v466_v15 = vsel %vm2416_vm5, %v459_v13, %v465_v11 }
  0x41   : > { %464 = vst [vmem:[#allocation2] sm:$0xf] %v463_v14 }
  0x42   : > { %467 = vst [vmem:[#allocation2 + $0x4] sm:$0x1] %v466_v15 }
  0x43 PF: > { %p1723_p9 = scmp.ge.s32.totalorder %s2285_s21, 1 }
  0x45   : > { %471 = sbr.rel (%p1723_p9) target bundleno = 94 (0x5e), region = 44 }
  0x4a   : > { %v1726_v16 = vld [vmem:[%s2392_s19 + $0x10] sm:$0xf]  ;;  %v2261_v17 = vld [vmem:[%s2822_s2] ss:$0 sm:$0xff]  ;;  %v500_v27 = vld [vmem:[#allocation2 + $0x28] sm:$0xf] }
  0x4b   : > { %v476_v18 = vunpack.c.l.bf16 %v1726_v16  ;;  %v2262_v19 = vld [vmem:[%s2823_s3] ss:$0 sm:$0xff]  ;;  %v503_v28 = vld [vmem:[#allocation2 + $0x2c] sm:$0x1] }
  0x4d   : > { %v481_v20 = vmul.f32 %v2261_v17, %v476_v18 }
  0x4f   : > { %v486_v21 = vadd.f32 %v2262_v19, %v481_v20 }
  0x51   : > { %v487_v22 = vmax.f32 %v486_v21, 0.0 }
  0x53   : > { %v488_v23 = vpack.c.bf16 %v487_v22, %v487_v22 }
  0x55   : > { %v490_v24 = vshrl.u32 %v488_v23, 16  ;;  %v493_v25 = vshll.u32 %v488_v23, 16 }
  0x57   : > { %v492_v26 = vrot.slane %v490_v24, 7 }
  0x59   : > { %v495_v29 = vor.u32 %v493_v25, %v492_v26  ;;  %v496_v30 = vrot.slane %v492_v26, 4 }
  0x5b   : > { %v501_v31 = vsel %vm2412_vm4, %v495_v29, %v500_v27  ;;  %v504_v32 = vsel %vm2416_vm5, %v496_v30, %v503_v28 }
  0x5c   : > { %502 = vst [vmem:[#allocation2 + $0x28] sm:$0xf] %v501_v31 }
  0x5d   : > { %505 = vst [vmem:[#allocation2 + $0x2c] sm:$0x1] %v504_v32 }
  0x5e PF: > { %v2147_v34 = vld [vmem:[%s2821_s1 + $0xf8] sm:$0xff]  ;;  %v2146_v37 = vld [vmem:[%s2821_s1 + $0xf0] sm:$0xff]  ;;  %v2145_v41 = vld [vmem:[%s2821_s1 + $0xe8] sm:$0xff] }
  0x5f   : > { %v2155_v35 = vld [vmem:[%s2821_s1 + $0x138] sm:$0xff]  ;;  %895 = vmatpush.bf16.msra.mxu0 %v2147_v34  ;;  %v2154_v38 = vld [vmem:[%s2821_s1 + $0x130] sm:$0xff]  ;;  %v2153_v42 = vld [vmem:[%s2821_s1 + $0x128] sm:$0xff] }
  0x60   : > { %v2163_v36 = vld [vmem:[%s2821_s1 + $0x178] sm:$0xff]  ;;  %914 = vmatpush.bf16.msra.mxu1 %v2155_v35  ;;  %v2162_v39 = vld [vmem:[%s2821_s1 + $0x170] sm:$0xff]  ;;  %v2161_v43 = vld [vmem:[%s2821_s1 + $0x168] sm:$0xff] }
  0x61   : > { %v2123_v33 = vld [vmem:[%s2821_s1 + $0x38] sm:$0xff]  ;;  %933 = vmatpush.bf16.msra.mxu2 %v2163_v36  ;;  %v2122_v40 = vld [vmem:[%s2821_s1 + $0x30] sm:$0xff]  ;;  %v2121_v44 = vld [vmem:[%s2821_s1 + $0x28] sm:$0xff] }
  0x62   : > { %1108 = vmatpush.bf16.msra.mxu3 %v2123_v33  ;;  %v2144_v45 = vld [vmem:[%s2821_s1 + $0xe0] sm:$0xff]  ;;  %v2509_v49 = vld [vmem:[#allocation2 + $0x8] sm:$0xf]  ;;  %v623_v50 = vld [vmem:[#allocation2 + $0xc] sm:$0x1] }
  0x63   : > { %896 = vmatpush.bf16.msra.mxu0 %v2146_v37  ;;  %v2152_v46 = vld [vmem:[%s2821_s1 + $0x120] sm:$0xff]  ;;  %v2511_v51 = vld [vmem:[#allocation2 + $0x10] sm:$0xf]  ;;  %v625_v52 = vld [vmem:[#allocation2 + $0x14] sm:$0x1]  ;;  %v638_v53 = vunpack.c.l.b16 %v2509_v49  ;;  %v639_v54 = vunpack.c.l.b16 %v623_v50 }
  0x64   : > { %915 = vmatpush.bf16.msra.mxu1 %v2154_v38  ;;  %v2160_v47 = vld [vmem:[%s2821_s1 + $0x160] sm:$0xff]  ;;  %v640_v55 = vunpack.c.l.b16 %v2511_v51  ;;  %v641_v56 = vunpack.c.l.b16 %v625_v52  ;;  %v2143_v57 = vld [vmem:[%s2821_s1 + $0xd8] sm:$0xff]  ;;  %v2142_v1 = vld [vmem:[%s2821_s1 + $0xd0] sm:$0xff] }
  0x65   : > { %934 = vmatpush.bf16.msra.mxu2 %v2162_v39  ;;  %v2120_v48 = vld [vmem:[%s2821_s1 + $0x20] sm:$0xff]  ;;  %v2151_v58 = vld [vmem:[%s2821_s1 + $0x118] sm:$0xff]  ;;  %v646_v59 = vpack.c.b16 %v639_v54, %v638_v53  ;;  %v2150_v2 = vld [vmem:[%s2821_s1 + $0x110] sm:$0xff] }
  0x66   : > { %1109 = vmatpush.bf16.msra.mxu3 %v2122_v40  ;;  %v647_v60 = vpack.c.b16 %v641_v56, %v640_v55  ;;  %v2159_v61 = vld [vmem:[%s2821_s1 + $0x158] sm:$0xff]  ;;  %v2158_v5 = vld [vmem:[%s2821_s1 + $0x150] sm:$0xff]  ;;  %v2545_v11 = vld [vmem:[#allocation2 + $0x20] sm:$0xf] }
  0x67   : > { %897 = vmatpush.bf16.msra.mxu0 %v2145_v41  ;;  %v2119_v62 = vld [vmem:[%s2821_s1 + $0x18] sm:$0xff]  ;;  %v653_v63 = vshll.u32 %v646_v59, 16  ;;  %v651_v3 = vshrl.u32 %v646_v59, 16  ;;  %v2118_v6 = vld [vmem:[%s2821_s1 + $0x10] sm:$0xff]  ;;  %v629_v12 = vld [vmem:[#allocation2 + $0x24] sm:$0x1]  ;;  %v644_v15 = vunpack.c.l.b16 %v2545_v11 }
  0x68   : > { %916 = vmatpush.bf16.msra.mxu1 %v2153_v42  ;;  %v660_v0 = vshll.u32 %v647_v60, 16  ;;  %v658_v4 = vshrl.u32 %v647_v60, 16  ;;  %v2543_v9 = vld [vmem:[#allocation2 + $0x18] sm:$0xf]  ;;  %v627_v10 = vld [vmem:[#allocation2 + $0x1c] sm:$0x1]  ;;  %v645_v18 = vunpack.c.l.b16 %v629_v12 }
  0x69   : > { %935 = vmatpush.bf16.msra.mxu2 %v2161_v43  ;;  %v655_v7 = vrot.slane %v653_v63, 1  ;;  %v642_v13 = vunpack.c.l.b16 %v2543_v9  ;;  %v643_v14 = vunpack.c.l.b16 %v627_v10  ;;  %v2141_v19 = vld [vmem:[%s2821_s1 + $0xc8] sm:$0xff]  ;;  %v678_v22 = vrot.slane %v646_v59, 1  ;;  %v2561_v25 = vld [vmem:[#allocation2] sm:$0xf]  ;;  %v2131_v39 = vld [vmem:[%s2821_s1 + $0x78] sm:$0xff] }
  0x6a   : > { %1110 = vmatpush.bf16.msra.mxu3 %v2121_v44  ;;  %v662_v8 = vrot.slane %v660_v0, 1  ;;  %v2149_v20 = vld [vmem:[%s2821_s1 + $0x108] sm:$0xff]  ;;  %v679_v23 = vrot.slane %v647_v60, 1  ;;  %v2571_v28 = vpack.c.b16 %v645_v18, %v644_v15  ;;  %v2140_v31 = vld [vmem:[%s2821_s1 + $0xc0] sm:$0xff]  ;;  %v522_v36 = vunpack.c.l.b16 %v2561_v25  ;;  %v2139_v40 = vld [vmem:[%s2821_s1 + $0xb8] sm:$0xff] }
  0x6b   : > { %898 = vmatpush.bf16.msra.mxu0 %v2144_v45  ;;  %v656_v16 = vor.u32 %v655_v7, %v651_v3  ;;  %v2157_v21 = vld [vmem:[%s2821_s1 + $0x148] sm:$0xff]  ;;  %v2567_v27 = vpack.c.b16 %v643_v14, %v642_v13  ;;  %v2148_v32 = vld [vmem:[%s2821_s1 + $0x100] sm:$0xff]  ;;  %v683_v34 = vunpack.c.l.b16 %v678_v22  ;;  %v739_v43 = vpack.c.b16 %v640_v55, %v638_v53  ;;  %v2130_v49 = vld [vmem:[%s2821_s1 + $0x70] sm:$0xff] }
  0x6c   : > { %917 = vmatpush.bf16.msra.mxu1 %v2152_v46  ;;  %v663_v17 = vor.u32 %v662_v8, %v658_v4  ;;  %v2117_v24 = vld [vmem:[%s2821_s1 + $0x8] sm:$0xff]  ;;  %v685_v35 = vunpack.c.l.b16 %v679_v23  ;;  %v2156_v37 = vld [vmem:[%s2821_s1 + $0x140] sm:$0xff]  ;;  %v674_v42 = vshll.u32 %v2571_v28, 16  ;;  %v2138_v50 = vld [vmem:[%s2821_s1 + $0xb0] sm:$0xff]  ;;  %v672_v53 = vshrl.u32 %v2571_v28, 16 }
  0x6d   : > { %936 = vmatpush.bf16.msra.mxu2 %v2160_v47  ;;  %v2563_v26 = vld [vmem:[#allocation2 + $0x8] sm:$0xf]  ;;  %v682_v29 = vunpack.c.l.b16 %v656_v16  ;;  %v2116_v38 = vld [vmem:[%s2821_s1] sm:$0xff]  ;;  %v667_v41 = vshll.u32 %v2567_v27, 16  ;;  %v2171_v47 = vld [vmem:[%s2821_s1 + $0x1b8] sm:$0xff]  ;;  %v665_v51 = vshrl.u32 %v2567_v27, 16 }
  0x6e   : > { %1111 = vmatpush.bf16.msra.mxu3 %v2120_v48  ;;  %v684_v30 = vunpack.c.l.b16 %v663_v17  ;;  %v524_v33 = vunpack.c.l.b16 %v2563_v26  ;;  %v741_v45 = vpack.c.b16 %v685_v35, %v683_v34  ;;  %v2179_v48 = vld [vmem:[%s2821_s1 + $0x1f8] sm:$0xff]  ;;  %v676_v54 = vrot.slane %v674_v42, 1  ;;  %v507_v55 = vld [vmem:[#allocation2 + $0x4] sm:$0x1]  ;;  %v509_v56 = vld [vmem:[#allocation2 + $0xc] sm:$0x1] }
  0x6f   : > { %899 = vmatpush.bf16.msra.mxu0 %v2143_v57  ;;  %v669_v52 = vrot.slane %v667_v41, 1  ;;  %v2613_v57 = vld [vmem:[#allocation2 + $0x10] sm:$0xf]  ;;  %v2615_v59 = vld [vmem:[#allocation2 + $0x18] sm:$0xf]  ;;  %v523_v63 = vunpack.c.l.b16 %v507_v55  ;;  %v525_v0 = vunpack.c.l.b16 %v509_v56  ;;  %v2169_v10 = vld [vmem:[%s2821_s1 + $0x1a8] sm:$0xff] }
  0x70   : > { %918 = vmatpush.bf16.msra.mxu1 %v2151_v58  ;;  %v740_v44 = vpack.c.b16 %v684_v30, %v682_v29  ;;  %v952_v46 = vpack.c.b16 %v524_v33, %v522_v36  ;;  %v1167_v58 = vld [vmem:[#allocation2 + $0x14] sm:$0x1]  ;;  %v1169_v60 = vld [vmem:[#allocation2 + $0x1c] sm:$0x1]  ;;  %v677_v4 = vor.u32 %v676_v54, %v672_v53  ;;  %v1184_v7 = vunpack.c.l.b16 %v2615_v59  ;;  %v2177_v16 = vld [vmem:[%s2821_s1 + $0x1e8] sm:$0xff] }
  0x71   : > { %937 = vmatpush.bf16.msra.mxu2 %v2159_v61  ;;  %v2170_v61 = vld [vmem:[%s2821_s1 + $0x1b0] sm:$0xff]  ;;  %v670_v3 = vor.u32 %v669_v52, %v665_v51  ;;  %v1185_v8 = vunpack.c.l.b16 %v1169_v60  ;;  %v680_v12 = vrot.slane %v2567_v27, 1  ;;  %v681_v14 = vrot.slane %v2571_v28, 1  ;;  %v2641_v18 = vld [vmem:[#allocation2 + $0x18] sm:$0xf]  ;;  %v2136_v22 = vld [vmem:[%s2821_s1 + $0xa0] sm:$0xff] }
  0x72   : > { %1112 = vmatpush.bf16.msra.mxu3 %v2119_v62  ;;  %v2178_v62 = vld [vmem:[%s2821_s1 + $0x1f0] sm:$0xff]  ;;  %v528_v30 = vunpack.c.l.b16 %v2641_v18  ;;  %v2127_v34 = vld [vmem:[%s2821_s1 + $0x58] sm:$0xff]  ;;  %v2709_v55 = vld [vmem:[#allocation2 + $0x20] sm:$0xf] }
  0x73   : > { %900 = vmatpush.bf16.msra.mxu0 %v2142_v1  ;;  %v2129_v1 = vld [vmem:[%s2821_s1 + $0x68] sm:$0xff]  ;;  %v2639_v17 = vld [vmem:[#allocation2 + $0x10] sm:$0xf]  ;;  %v686_v23 = vunpack.c.l.b16 %v670_v3  ;;  %v2659_v26 = vpack.c.b16 %v1185_v8, %v1184_v7  ;;  %v687_v27 = vunpack.c.l.b16 %v680_v12  ;;  %v689_v28 = vunpack.c.l.b16 %v681_v14  ;;  %v2135_v35 = vld [vmem:[%s2821_s1 + $0x98] sm:$0xff] }
  0x74   : > { %919 = vmatpush.bf16.msra.mxu1 %v2150_v2  ;;  %v2137_v2 = vld [vmem:[%s2821_s1 + $0xa8] sm:$0xff]  ;;  %v526_v29 = vunpack.c.l.b16 %v2639_v17  ;;  %v2167_v9 = vld [vmem:[%s2821_s1 + $0x198] sm:$0xff]  ;;  %v2166_v53 = vld [vmem:[%s2821_s1 + $0x190] sm:$0xff] }
  0x75   : > { %938 = vmatpush.bf16.msra.mxu2 %v2158_v5  ;;  %v1182_v5 = vunpack.c.l.b16 %v2613_v57  ;;  %v744_v41 = vpack.c.b16 %v689_v28, %v687_v27  ;;  %v2175_v11 = vld [vmem:[%s2821_s1 + $0x1d8] sm:$0xff]  ;;  %v1202_v51 = vshrl.u32 %v2659_v26, 16  ;;  %v2174_v54 = vld [vmem:[%s2821_s1 + $0x1d0] sm:$0xff]  ;;  %v1171_v56 = vld [vmem:[#allocation2 + $0x24] sm:$0x1] }
  0x76   : > { %1113 = vmatpush.bf16.msra.mxu3 %v2118_v6  ;;  %v1183_v6 = vunpack.c.l.b16 %v1167_v58  ;;  %v955_v42 = vpack.c.b16 %v528_v30, %v526_v29  ;;  %v2711_v58 = vld [vmem:[#allocation2 + $0x28] sm:$0xf]  ;;  %v1173_v60 = vld [vmem:[#allocation2 + $0x2c] sm:$0x1]  ;;  %v1187_v12 = vunpack.c.l.b16 %v1171_v56  ;;  %v2187_v17 = vld [vmem:[%s2821_s1 + $0x238] sm:$0xff] }
  0x77   : > { %901 = vmatpush.bf16.msra.mxu0 %v2141_v19  ;;  %v2643_v19 = vpack.c.b16 %v523_v63, %v522_v36  ;;  %v2125_v63 = vld [vmem:[%s2821_s1 + $0x48] sm:$0xff]  ;;  %v1188_v14 = vunpack.c.l.b16 %v2711_v58 }
  0x78   : > { %920 = vmatpush.bf16.msra.mxu1 %v2149_v20  ;;  %v2645_v20 = vpack.c.b16 %v525_v0, %v524_v33  ;;  %v2655_v25 = vpack.c.b16 %v1183_v6, %v1182_v5  ;;  %v2133_v0 = vld [vmem:[%s2821_s1 + $0x88] sm:$0xff] }
  0x79   : > { %939 = vmatpush.bf16.msra.mxu2 %v2157_v21  ;;  %v2128_v21 = vld [vmem:[%s2821_s1 + $0x60] sm:$0xff]  ;;  %v537_v36 = vshll.u32 %v2643_v19, 16 }
  0x7a   : > { %1114 = vmatpush.bf16.msra.mxu3 %v2117_v24  ;;  %v688_v24 = vunpack.c.l.b16 %v677_v4  ;;  %v544_v33 = vshll.u32 %v2645_v20, 16  ;;  %v1222_v58 = vrot.slane %v2655_v25, 1 }
  0x7b   : > { %902 = vmatpush.bf16.msra.mxu0 %v2140_v31  ;;  %v2168_v31 = vld [vmem:[%s2821_s1 + $0x1a0] sm:$0xff] }
  0x7c   : > { %921 = vmatpush.bf16.msra.mxu1 %v2148_v32  ;;  %v2176_v32 = vld [vmem:[%s2821_s1 + $0x1e0] sm:$0xff] }
  0x7d   : > { %940 = vmatpush.bf16.msra.mxu2 %v2156_v37  ;;  %v742_v37 = vpack.c.b16 %v644_v15, %v642_v13  ;;  %v2126_v13 = vld [vmem:[%s2821_s1 + $0x50] sm:$0xff] }
  0x7e   : > { %1115 = vmatpush.bf16.msra.mxu3 %v2116_v38  ;;  %903 = vmatmul.bf16.vlgmr.msra.gmra.mxu0 %v739_v43  ;;  %v743_v38 = vpack.c.b16 %v688_v24, %v686_v23  ;;  %v511_v43 = vld [vmem:[#allocation2 + $0x14] sm:$0x1]  ;;  %v2124_v23 = vld [vmem:[%s2821_s1 + $0x40] sm:$0xff] }
  0x7f   : > { %1127 = vmatpush.bf16.msrb.mxu0 %v2131_v39  ;;  %922 = vmatmul.bf16.vlgmr.msra.gmra.mxu1 %v740_v44  ;;  %v1197_v39 = vshll.u32 %v2655_v25, 16  ;;  %v2134_v15 = vld [vmem:[%s2821_s1 + $0x90] sm:$0xff]  ;;  %v535_v44 = vshrl.u32 %v2643_v19, 16  ;;  %v2132_v24 = vld [vmem:[%s2821_s1 + $0x80] sm:$0xff] }
  0x80   : > { %1146 = vmatpush.bf16.msrb.mxu1 %v2139_v40  ;;  %941 = vmatmul.bf16.vlgmr.msra.gmra.mxu2 %v741_v45  ;;  %v1204_v40 = vshll.u32 %v2659_v26, 16  ;;  %v539_v45 = vrot.slane %v537_v36, 1  ;;  %v2172_v36 = vld [vmem:[%s2821_s1 + $0x1c0] sm:$0xff] }
  0x81   : > { %1116 = vmatmul.bf16.vlgmr.msra.gmra.mxu3 %v952_v46  ;;  %1439 = vmatpush.bf16.msrb.mxu2 %v2171_v47  ;;  %v542_v46 = vshrl.u32 %v2645_v20, 16  ;;  %v546_v47 = vrot.slane %v544_v33, 1 }
  0x82   : > { %1458 = vmatpush.bf16.msrb.mxu3 %v2179_v48  ;;  %v513_v48 = vld [vmem:[#allocation2 + $0x1c] sm:$0x1]  ;;  %v1206_v52 = vrot.slane %v1204_v40, 1  ;;  %v540_v3 = vor.u32 %v539_v45, %v535_v44  ;;  %v1283_v40 = vpack.c.b16 %v1184_v7, %v1182_v5  ;;  %v2185_v45 = vld [vmem:[%s2821_s1 + $0x228] sm:$0xff] }
  0x83   : > { %1128 = vmatpush.bf16.msrb.mxu0 %v2130_v49  ;;  %v1195_v49 = vshrl.u32 %v2655_v25, 16  ;;  %v547_v4 = vor.u32 %v546_v47, %v542_v46 }
  0x84   : > { %1147 = vmatpush.bf16.msrb.mxu1 %v2138_v50  ;;  %v1199_v50 = vrot.slane %v1197_v39, 1  ;;  %v1207_v8 = vor.u32 %v1206_v52, %v1202_v51  ;;  %v566_v27 = vunpack.c.l.b16 %v540_v3  ;;  %v2184_v52 = vld [vmem:[%s2821_s1 + $0x220] sm:$0xff] }
  0x85   : > { %1440 = vmatpush.bf16.msrb.mxu2 %v2170_v61  ;;  %v527_v61 = vunpack.c.l.b16 %v511_v43  ;;  %v568_v28 = vunpack.c.l.b16 %v547_v4  ;;  %v2182_v4 = vld [vmem:[%s2821_s1 + $0x210] sm:$0xff] }
  0x86   : > { %1459 = vmatpush.bf16.msrb.mxu3 %v2178_v62  ;;  %v529_v62 = vunpack.c.l.b16 %v513_v48  ;;  %v1200_v6 = vor.u32 %v1199_v50, %v1195_v49 }
  0x87   : > { %1129 = vmatpush.bf16.msrb.mxu0 %v2129_v1  ;;  %v562_v1 = vrot.slane %v2643_v19, 1  ;;  %v2173_v19 = vld [vmem:[%s2821_s1 + $0x1c8] sm:$0xff]  ;;  %v953_v33 = vpack.c.b16 %v568_v28, %v566_v27 }
  0x88   : > { %1148 = vmatpush.bf16.msrb.mxu1 %v2137_v2  ;;  %v563_v2 = vrot.slane %v2645_v20, 1  ;;  %v532_v20 = vpack.c.b16 %v527_v61, %v526_v29  ;;  %v1226_v18 = vunpack.c.l.b16 %v1200_v6  ;;  %v1228_v29 = vunpack.c.l.b16 %v1207_v8 }
  0x89   : > { %1441 = vmatpush.bf16.msrb.mxu2 %v2169_v10  ;;  %v1186_v10 = vunpack.c.l.b16 %v2709_v55  ;;  %v2181_v55 = vld [vmem:[%s2821_s1 + $0x208] sm:$0xff]  ;;  %v1223_v6 = vrot.slane %v2659_v26, 1 }
  0x8a   : > { %1460 = vmatpush.bf16.msrb.mxu3 %v2177_v16  ;;  %v1189_v16 = vunpack.c.l.b16 %v1173_v60  ;;  %v564_v48 = vrot.slane %v532_v20, 1 }
  0x8b   : > { %1130 = vmatpush.bf16.msrb.mxu0 %v2128_v21  ;;  %v2165_v21 = vld [vmem:[%s2821_s1 + $0x188] sm:$0xff] }
  0x8c   : > { %1149 = vmatpush.bf16.msrb.mxu1 %v2136_v22  ;;  %v533_v22 = vpack.c.b16 %v529_v62, %v528_v30  ;;  %v2744_v30 = vpack.c.b16 %v1187_v12, %v1186_v10  ;;  %v571_v56 = vunpack.c.l.b16 %v564_v48  ;;  %v2180_v12 = vld [vmem:[%s2821_s1 + $0x200] sm:$0xff] }
  0x8d   : > { %1442 = vmatpush.bf16.msrb.mxu2 %v2168_v31  ;;  %v567_v31 = vunpack.c.l.b16 %v562_v1 }
  0x8e   : > { %1461 = vmatpush.bf16.msrb.mxu3 %v2176_v32  ;;  %908 = vmatmul.bf16.gmra.mxu0 %v742_v37  ;;  %v569_v32 = vunpack.c.l.b16 %v563_v2  ;;  %v558_v39 = vshll.u32 %v533_v22, 16  ;;  %v1209_v59 = vshrl.u32 %v2744_v30, 16  ;;  %v565_v49 = vrot.slane %v533_v22, 1 }
  0x8f   : > { %1131 = vmatpush.bf16.msrb.mxu0 %v2127_v34  ;;  %927 = vmatmul.bf16.gmra.mxu1 %v743_v38  ;;  %v2748_v34 = vpack.c.b16 %v1189_v16, %v1188_v14  ;;  %v551_v38 = vshll.u32 %v532_v20, 16  ;;  %v1286_v2 = vpack.c.b16 %v1188_v14, %v1186_v10  ;;  %v1224_v8 = vrot.slane %v2744_v30, 1 }
  0x90   : > { %1150 = vmatpush.bf16.msrb.mxu1 %v2135_v35  ;;  %946 = vmatmul.bf16.gmra.mxu2 %v744_v41  ;;  %v2164_v35 = vld [vmem:[%s2821_s1 + $0x180] sm:$0xff]  ;;  %v954_v37 = vpack.c.b16 %v569_v32, %v567_v31  ;;  %v1284_v41 = vpack.c.b16 %v1228_v29, %v1226_v18  ;;  %v560_v57 = vrot.slane %v558_v39, 1  ;;  %v573_v60 = vunpack.c.l.b16 %v565_v49 }
  0x91   : > { %1121 = vmatmul.bf16.gmra.mxu3 %v955_v42  ;;  %1443 = vmatpush.bf16.msrb.mxu2 %v2167_v9  ;;  %v1211_v42 = vshll.u32 %v2744_v30, 16  ;;  %v1218_v43 = vshll.u32 %v2748_v34, 16  ;;  %v2186_v9 = vld [vmem:[%s2821_s1 + $0x230] sm:$0xff]  ;;  %v1216_v7 = vshrl.u32 %v2748_v34, 16  ;;  %v1225_v10 = vrot.slane %v2748_v34, 1 }
  0x92   : > { %1462 = vmatpush.bf16.msrb.mxu3 %v2175_v11  ;;  %v549_v11 = vshrl.u32 %v532_v20, 16  ;;  %v957_v1 = vpack.c.b16 %v573_v60, %v571_v56  ;;  %v1227_v14 = vunpack.c.l.b16 %v1222_v58  ;;  %v1229_v16 = vunpack.c.l.b16 %v1223_v6 }
  0x93   : > { %1132 = vmatpush.bf16.msrb.mxu0 %v2126_v13  ;;  %v553_v13 = vrot.slane %v551_v38, 1  ;;  %v1213_v5 = vrot.slane %v1211_v42, 1  ;;  %v1220_v44 = vrot.slane %v1218_v43, 1 }
  0x94   : > { %1151 = vmatpush.bf16.msrb.mxu1 %v2134_v15  ;;  %v556_v15 = vshrl.u32 %v533_v22, 16  ;;  %v1285_v20 = vpack.c.b16 %v1229_v16, %v1227_v14 }
  0x95   : > { %1444 = vmatpush.bf16.msrb.mxu2 %v2166_v53  ;;  %v554_v46 = vor.u32 %v553_v13, %v549_v11  ;;  %v1214_v50 = vor.u32 %v1213_v5, %v1209_v59  ;;  %v1221_v51 = vor.u32 %v1220_v44, %v1216_v7 }
  0x96   : > { %1463 = vmatpush.bf16.msrb.mxu3 %v2174_v54  ;;  %v561_v47 = vor.u32 %v560_v57, %v556_v15 }
  0x97   : > { %1133 = vmatpush.bf16.msrb.mxu0 %v2125_v63  ;;  %v570_v53 = vunpack.c.l.b16 %v554_v46  ;;  %v1230_v61 = vunpack.c.l.b16 %v1214_v50  ;;  %v1232_v62 = vunpack.c.l.b16 %v1221_v51  ;;  %v2183_v63 = vld [vmem:[%s2821_s1 + $0x218] sm:$0xff] }
  0x98   : > { %1152 = vmatpush.bf16.msrb.mxu1 %v2133_v0  ;;  %v572_v54 = vunpack.c.l.b16 %v561_v47 }
  0x99   : > { %1445 = vmatpush.bf16.msrb.mxu2 %v2165_v21  ;;  %v1287_v3 = vpack.c.b16 %v1232_v62, %v1230_v61  ;;  %v1231_v21 = vunpack.c.l.b16 %v1224_v8 }
  0x9a   : > { %1464 = vmatpush.bf16.msrb.mxu3 %v2173_v19  ;;  %v956_v0 = vpack.c.b16 %v572_v54, %v570_v53  ;;  %v1233_v19 = vunpack.c.l.b16 %v1225_v10 }
  0x9b   : > { %1134 = vmatpush.bf16.msrb.mxu0 %v2124_v23 }
  0x9c   : > { %1153 = vmatpush.bf16.msrb.mxu1 %v2132_v24  ;;  %v1288_v25 = vpack.c.b16 %v1233_v19, %v1231_v21 }
  0x9d   : > { %1446 = vmatpush.bf16.msrb.mxu2 %v2164_v35 }
  0x9e   : > { %1465 = vmatpush.bf16.msrb.mxu3 %v2172_v36  ;;  %1135 = vmatmul.bf16.vlgmr.msrb.gmra.mxu0 %v953_v33 }
  0x9f   : > { %1477 = vmatpush.bf16.msra.mxu0 %v2187_v17  ;;  %1154 = vmatmul.bf16.vlgmr.msrb.gmra.mxu1 %v954_v37 }
  0xa0   : > { %2208 = vmatpush.bf16.msra.mxu1 %v2187_v17  ;;  %1447 = vmatmul.bf16.vlgmr.msrb.gmra.mxu2 %v1283_v40 }
  0xa1   : > { %1466 = vmatmul.bf16.vlgmr.msrb.gmra.mxu3 %v1284_v41 }
  0xa3   : > { %1478 = vmatpush.bf16.msra.mxu0 %v2186_v9 }
  0xa4   : > { %2209 = vmatpush.bf16.msra.mxu1 %v2186_v9 }
  0xa7   : > { %1479 = vmatpush.bf16.msra.mxu0 %v2185_v45 }
  0xa8   : > { %2210 = vmatpush.bf16.msra.mxu1 %v2185_v45 }
  0xab   : > { %1480 = vmatpush.bf16.msra.mxu0 %v2184_v52 }
  0xac   : > { %2211 = vmatpush.bf16.msra.mxu1 %v2184_v52 }
  0xae   : > { %1140 = vmatmul.bf16.gmra.mxu0 %v956_v0 }
  0xaf   : > { %1481 = vmatpush.bf16.msra.mxu0 %v2183_v63  ;;  %1159 = vmatmul.bf16.gmra.mxu1 %v957_v1 }
  0xb0   : > { %2212 = vmatpush.bf16.msra.mxu1 %v2183_v63  ;;  %1452 = vmatmul.bf16.gmra.mxu2 %v1286_v2 }
  0xb1   : > { %1471 = vmatmul.bf16.gmra.mxu3 %v1287_v3 }
  0xb3   : > { %1482 = vmatpush.bf16.msra.mxu0 %v2182_v4 }
  0xb4   : > { %2213 = vmatpush.bf16.msra.mxu1 %v2182_v4 }
  0xb7   : > { %1483 = vmatpush.bf16.msra.mxu0 %v2181_v55 }
  0xb8   : > { %2214 = vmatpush.bf16.msra.mxu1 %v2181_v55 }
  0xbb   : > { %1484 = vmatpush.bf16.msra.mxu0 %v2180_v12 }
  0xbc   : > { %2215 = vmatpush.bf16.msra.mxu1 %v2180_v12 }
  0xbe   : > { %1485 = vmatmul.bf16.vlgmr.msra.gmra.mxu0 %v1285_v20 }
  0xbf   : > { %1490 = vmatmul.bf16.vlgmr.msra.gmra.mxu1 %v1288_v25 }
  0xfb   : > { %v904_v26 = vpop.f32.mrf.mxu0 }
  0xfc   : > { %v923_v22 = vpop.f32.mrf.mxu1 }
  0xfd   : > { %v924_v59 = vadd.f32 %v923_v22, %v904_v26 }
 0x103   : > { %v942_v23 = vpop.f32.mrf.mxu2  ;;  %v906_v27 = vpop.f32.mrf.mxu0 }
 0x104   : > { %v1117_v24 = vpop.f32.mrf.mxu3  ;;  %v925_v28 = vpop.f32.mrf.mxu1  ;;  %v943_v44 = vadd.f32 %v942_v23, %v924_v59 }
 0x105   : > { %v926_v45 = vadd.f32 %v925_v28, %v906_v27 }
 0x106   : > { %v1118_v51 = vadd.f32 %v1117_v24, %v943_v44 }
 0x10b   : > { %v944_v31 = vpop.f32.mrf.mxu2  ;;  %v909_v17 = vpop.f32.mrf.mxu0 }
 0x10c   : > { %v1119_v32 = vpop.f32.mrf.mxu3  ;;  %v928_v18 = vpop.f32.mrf.mxu1  ;;  %v945_v48 = vadd.f32 %v944_v31, %v926_v45 }
 0x10d   : > { %v929_v46 = vadd.f32 %v928_v18, %v909_v17 }
 0x10e   : > { %v1120_v54 = vadd.f32 %v1119_v32, %v945_v48 }
 0x113   : > { %v947_v29 = vpop.f32.mrf.mxu2  ;;  %v911_v34 = vpop.f32.mrf.mxu0 }
 0x114   : > { %v1122_v30 = vpop.f32.mrf.mxu3  ;;  %v930_v35 = vpop.f32.mrf.mxu1  ;;  %v948_v49 = vadd.f32 %v947_v29, %v929_v46 }
 0x115   : > { %v931_v47 = vadd.f32 %v930_v35, %v911_v34 }
 0x116   : > { %v1123_v61 = vadd.f32 %v1122_v30, %v948_v49 }
 0x11b   : > { %v949_v36 = vpop.f32.mrf.mxu2  ;;  %v1136_v37 = vpop.f32.mrf.mxu0 }
 0x11c   : > { %v1124_v33 = vpop.f32.mrf.mxu3  ;;  %v1155_v38 = vpop.f32.mrf.mxu1  ;;  %v950_v50 = vadd.f32 %v949_v36, %v931_v47  ;;  %v1137_v56 = vadd.f32 %v1136_v37, %v1118_v51 }
 0x11e   : > { %v1125_v62 = vadd.f32 %v1124_v33, %v950_v50  ;;  %v1156_v58 = vadd.f32 %v1155_v38, %v1137_v56 }
 0x123   : > { %v1448_v39 = vpop.f32.mrf.mxu2  ;;  %v1138_v41 = vpop.f32.mrf.mxu0 }
 0x124   : > { %v1467_v40 = vpop.f32.mrf.mxu3  ;;  %v1157_v42 = vpop.f32.mrf.mxu1  ;;  %v1139_v0 = vadd.f32 %v1138_v41, %v1120_v54 }
 0x125   : > { %v1468_v60 = vadd.f32 %v1467_v40, %v1448_v39 }
 0x126   : > { %v1158_v12 = vadd.f32 %v1157_v42, %v1139_v0 }
 0x12b   : > { %v1450_v43 = vpop.f32.mrf.mxu2  ;;  %v1141_v11 = vpop.f32.mrf.mxu0 }
 0x12c   : > { %v1469_v9 = vpop.f32.mrf.mxu3  ;;  %v1160_v13 = vpop.f32.mrf.mxu1  ;;  %v1142_v4 = vadd.f32 %v1141_v11, %v1123_v61 }
 0x12d   : > { %v1470_v6 = vadd.f32 %v1469_v9, %v1450_v43 }
 0x12e   : > { %v1161_v19 = vadd.f32 %v1160_v13, %v1142_v4 }
 0x133   : > { %v1143_v15 = vpop.f32.mrf.mxu0  ;;  %v1453_v5 = vpop.f32.mrf.mxu2 }
 0x134   : > { %v1162_v57 = vpop.f32.mrf.mxu1  ;;  %v1472_v7 = vpop.f32.mrf.mxu3  ;;  %v1144_v55 = vadd.f32 %v1143_v15, %v1125_v62 }
 0x135   : > { %v1473_v63 = vadd.f32 %v1472_v7, %v1453_v5 }
 0x136   : > { %v1163_v20 = vadd.f32 %v1162_v57, %v1144_v55 }
 0x13b   : > { %v1486_v52 = vpop.f32.mrf.mxu0  ;;  %v1455_v2 = vpop.f32.mrf.mxu2 }
 0x13c   : > { %v1491_v53 = vpop.f32.mrf.mxu1  ;;  %v1487_v1 = vadd.f32 %v1486_v52, %v1468_v60  ;;  %v1474_v3 = vpop.f32.mrf.mxu3 }
 0x13d   : > { %v1492_v8 = vadd.f32 %v1491_v53, %v1473_v63  ;;  %v1475_v10 = vadd.f32 %v1474_v3, %v1455_v2 }
 0x13e   : > { %v1496_v14 = vadd.f32 %v1487_v1, %v1156_v58 }
 0x13f   : > { %v1498_v22 = vadd.f32 %v1492_v8, %v1161_v19 }
 0x140   : > { %v1518_v27 = vmul.f32 %v1496_v14, %v1496_v14 }
 0x141   : > { %v1520_v18 = vmul.f32 %v1498_v22, %v1498_v22 }
 0x143   : > { %v1488_v16 = vpop.f32.mrf.mxu0 }
 0x144   : > { %v1493_v21 = vpop.f32.mrf.mxu1  ;;  %v1489_v25 = vadd.f32 %v1488_v16, %v1470_v6 }
 0x145   : > { %v1494_v26 = vadd.f32 %v1493_v21, %v1475_v10 }
 0x146   : > { %v1497_v23 = vadd.f32 %v1489_v25, %v1158_v12 }
 0x147   : > { %v1499_v24 = vadd.f32 %v1494_v26, %v1163_v20 }
 0x148   : > { %v2199_v28 = vpack.c.bf16 %v1497_v23, %v1496_v14  ;;  %v1508_v31 = vadd.f32 %v1497_v23, %v1496_v14  ;;  %v1519_v32 = vmul.f32 %v1497_v23, %v1497_v23 }
 0x149   : > { %v2204_v17 = vpack.c.bf16 %v1499_v24, %v1498_v22  ;;  %v1521_v35 = vmul.f32 %v1499_v24, %v1499_v24 }
 0x14a   : > { %2200 = vst [vmem:[%s2385_s16] sm:$0xff] %v2199_v28   ;;  %v1522_v29 = vadd.f32 %v1519_v32, %v1518_v27  ;;  %v1509_v30 = vadd.f32 %v1508_v31, %v1498_v22 }
 0x14b   : > { %2207 = vst [vmem:[%s2385_s16 + $0x8] sm:$0xff] %v2204_v17  }
 0x14c   : > { %v1510_v34 = vadd.f32 %v1509_v30, %v1499_v24  ;;  %v1523_v36 = vadd.f32 %v1522_v29, %v1520_v18 }
 0x14e   : > { %v1511_v33 = vrot.slane %v1510_v34, 4  ;;  %v1524_v37 = vadd.f32 %v1523_v36, %v1521_v35 }
 0x150   : > { %v1512_v38 = vadd.f32 %v1511_v33, %v1510_v34  ;;  %v1525_v39 = vrot.slane %v1524_v37, 4 }
 0x152   : > { %v1513_v40 = vrot.slane %v1512_v38, 2  ;;  %v1526_v41 = vadd.f32 %v1525_v39, %v1524_v37 }
 0x154   : > { %v1514_v42 = vadd.f32 %v1513_v40, %v1512_v38  ;;  %v1527_v43 = vrot.slane %v1526_v41, 2 }
 0x156   : > { %v1515_v9 = vrot.slane %v1514_v42, 1  ;;  %v1528_v11 = vadd.f32 %v1527_v43, %v1526_v41 }
 0x158   : > { %v1516_v13 = vadd.f32 %v1515_v9, %v1514_v42  ;;  %v1529_v15 = vrot.slane %v1528_v11, 1 }
 0x15a   : > { %1517 = vst [vmem:[%s304_s8] sm:$0x1] %v1516_v13  ;;  %v1530_v57 = vadd.f32 %v1529_v15, %v1528_v11 }
 0x15c   : > { %1531 = vst [vmem:[%s311_s12] sm:$0x1] %v1530_v57 }
 0x15d PF: > { %s17_s25 = sadd.s32 1, %s2301_s25   ;;  %s2831_s21 = smov %s2293_s23 }
 0x15e   : > { %p14_p10 = scmp.ge.s32.totalorder %s17_s25, 6   ;;  %s2832_s22 = smov %s2297_s24 }
 0x15f   : > { %s2833_s23 = smov %s2836_s26  ;;  %s2834_s24 = smov %s2840_s27 }
 0x160   :  { %16 = sbr.rel (!%p14_p10) target bundleno = 3 (0x3), region = 106 }

</bundles_post_ra>
